<compile_context>
chip_gen: v5e
topology: v5e:2x2
jax: 0.10.0
libtpu: 0.0.40
codegen_flags: <defaults>
</compile_context>

<pallas_src>
import math

import jax
import jax.numpy as jnp
from jax.experimental import pallas as pl
from jax.experimental.pallas import tpu as pltpu


def _round_up(v, m):
    return ((v + m - 1) // m) * m


# --------------------------- kernels (one per layer) ---------------------------

def _gc1_kernel(adj_ref, x_ref, w1_ref, b1_ref, w2_ref, s2_ref):
    """s2[rows] = relu((adj[rows] @ x) @ W1 + b1) @ W2   (gc1 + ReLU + gc2 support)."""
    t = jnp.dot(adj_ref[...], x_ref[...], preferred_element_type=jnp.float32)
    z1 = jnp.dot(t.astype(jnp.bfloat16), w1_ref[...],
                 preferred_element_type=jnp.float32) + b1_ref[...]
    h1 = jnp.maximum(z1, 0.0)                     # ReLU in f32; dropout1 = identity
    s2_ref[...] = jnp.dot(h1.astype(jnp.bfloat16), w2_ref[...],
                          preferred_element_type=jnp.float32).astype(s2_ref.dtype)


def _gc2_kernel(adj_ref, s2_ref, b2_ref, w3_ref, s3_ref):
    """s3[rows] = relu(adj[rows] @ s2 + b2) @ W3   (gc2 + ReLU + gc3 support)."""
    z2 = jnp.dot(adj_ref[...], s2_ref[...],
                 preferred_element_type=jnp.float32) + b2_ref[...]
    h2 = jnp.maximum(z2, 0.0)                     # ReLU in f32; dropout2 = identity
    s3_ref[...] = jnp.dot(h2.astype(jnp.bfloat16), w3_ref[...],
                          preferred_element_type=jnp.float32).astype(s3_ref.dtype)


def _gc3_kernel(adj_ref, s3_ref, b3_ref, o_ref):
    """o[rows] = log_softmax(adj[rows] @ s3 + b3)   (gc3 + LogSoftmax, f32)."""
    z3 = jnp.dot(adj_ref[...], s3_ref[...],
                 preferred_element_type=jnp.float32) + b3_ref[...]
    m = jnp.max(z3, axis=-1, keepdims=True)
    s = z3 - m
    lse = jnp.log(jnp.sum(jnp.exp(s), axis=-1, keepdims=True))
    o_ref[...] = (s - lse).astype(o_ref.dtype)


# --------------------------------- wrapper -------------------------------------

def gcn_forward(x, adj, params, *, tm=256):
    """Full 3-layer GCN forward as three row-tiled Pallas calls."""
    w1, b1, w2, b2, w3, b3 = params
    n, f_in = x.shape
    h1 = w1.shape[1]
    h2 = w2.shape[1]
    f_out = w3.shape[1]

    # Row tile: MXU-friendly (256) but never larger than the 8-aligned node count.
    tm = min(tm, _round_up(n, 8))
    n_pad = _round_up(n, tm)
    r = n_pad // tm

    # Lane-pad the narrow gc3 output to a dense 128-lane slab: zero extra W3
    # columns, -1e30 extra bias lanes so they vanish under log-softmax.
    f_pad = _round_up(max(f_out, 128), 128)
    w3p = jnp.zeros((h2, f_pad), jnp.float32).at[:, :f_out].set(
        w3.astype(jnp.float32))
    b3p = jnp.full((1, f_pad), -1e30, jnp.float32).at[:, :f_out].set(
        b3.reshape(1, f_out).astype(jnp.float32))

    # Pad the node axis with zero rows/cols (contribute nothing; sliced off at
    # the end) and cast matmul operands to bf16 (f32 accumulation on the MXU).
    adj_b = jnp.zeros((n_pad, n_pad), jnp.bfloat16).at[:n, :n].set(
        adj.astype(jnp.bfloat16))
    x_b = jnp.zeros((n_pad, f_in), jnp.bfloat16).at[:n, :].set(
        x.astype(jnp.bfloat16))
    w1_b = w1.astype(jnp.bfloat16)
    w2_b = w2.astype(jnp.bfloat16)
    w3_b = w3p.astype(jnp.bfloat16)
    b1_f = b1.reshape(1, h1).astype(jnp.float32)
    b2_f = b2.reshape(1, h2).astype(jnp.float32)

    cparams = pltpu.CompilerParams(
        dimension_semantics=("parallel",),   # shard row tiles across TCs (v7x)
        vmem_limit_bytes=48 << 20,           # stay under v7x's 64 MiB physical VMEM
    )

    def _row_spec(cols):
        return pl.BlockSpec((tm, cols), lambda i: (i, 0))

    def _resident(shape):
        return pl.BlockSpec(shape, lambda i: (0, 0))

    # ---- gc1 (+ ReLU) fused with gc2's row-local feature transform ------------
    s2 = pl.pallas_call(
        _gc1_kernel,
        out_shape=jax.ShapeDtypeStruct((n_pad, h2), jnp.bfloat16),
        grid=(r,),
        in_specs=[
            _row_spec(n_pad),                 # adj row tile (streamed / pipelined)
            _resident((n_pad, f_in)),         # x (resident in VMEM)
            _resident((f_in, h1)),            # W1
            _resident((1, h1)),               # b1
            _resident((h1, h2)),              # W2
        ],
        out_specs=_row_spec(h2),
        compiler_params=cparams,
        cost_estimate=pl.CostEstimate(
            flops=2 * n_pad * (n_pad * f_in + f_in * h1 + h1 * h2),
            transcendentals=0,
            bytes_accessed=2 * (n_pad * n_pad + n_pad * f_in + f_in * h1
                                + h1 * h2 + n_pad * h2) + 4 * h1),
    )(adj_b, x_b, w1_b, b1_f, w2_b)

    # ---- gc2 (+ ReLU) fused with gc3's row-local feature transform ------------
    s3 = pl.pallas_call(
        _gc2_kernel,
        out_shape=jax.ShapeDtypeStruct((n_pad, f_pad), jnp.bfloat16),
        grid=(r,),
        in_specs=[
            _row_spec(n_pad),                 # adj row tile
            _resident((n_pad, h2)),           # s2 = h1 @ W2 (resident)
            _resident((1, h2)),               # b2
            _resident((h2, f_pad)),           # W3 (lane-padded)
        ],
        out_specs=_row_spec(f_pad),
        compiler_params=cparams,
        cost_estimate=pl.CostEstimate(
            flops=2 * n_pad * (n_pad * h2 + h2 * f_pad),
            transcendentals=0,
            bytes_accessed=2 * (n_pad * n_pad + n_pad * h2 + h2 * f_pad
                                + n_pad * f_pad) + 4 * h2),
    )(adj_b, s2, b2_f, w3_b)

    # ---- gc3 + LogSoftmax ------------------------------------------------------
    out_p = pl.pallas_call(
        _gc3_kernel,
        out_shape=jax.ShapeDtypeStruct((n_pad, f_pad), jnp.float32),
        grid=(r,),
        in_specs=[
            _row_spec(n_pad),                 # adj row tile
            _resident((n_pad, f_pad)),        # s3 = h2 @ W3 (resident)
            _resident((1, f_pad)),            # b3 (lane-padded with -1e30)
        ],
        out_specs=_row_spec(f_pad),
        compiler_params=cparams,
        cost_estimate=pl.CostEstimate(
            flops=2 * n_pad * n_pad * f_pad + 4 * n_pad * f_pad,
            transcendentals=n_pad * f_pad + n_pad,
            bytes_accessed=2 * (n_pad * n_pad + n_pad * f_pad)
                           + 4 * (f_pad + n_pad * f_pad)),
    )(adj_b, s3, b3p)

    return out_p[:n, :f_out]


# ------------------------------- params / refs ---------------------------------

def init_params(key, n_inputs, n_outputs, n_hiddens1=128, n_hiddens2=64):
    """Mirror GraphConvolution.reset_parameters: uniform(-1/sqrt(out), 1/sqrt(out))."""
    keys = jax.random.split(key, 6)

    def layer(kw, kb, fin, fout):
        stdv = 1.0 / math.sqrt(fout)
        w = jax.random.uniform(kw, (fin, fout), jnp.float32, -stdv, stdv)
        b = jax.random.uniform(kb, (1, fout), jnp.float32, -stdv, stdv)
        return w, b

    w1, b1 = layer(keys[0], keys[1], n_inputs, n_hiddens1)
    w2, b2 = layer(keys[2], keys[3], n_hiddens1, n_hiddens2)
    w3, b3 = layer(keys[4], keys[5], n_hiddens2, n_outputs)
    return (w1, b1, w2, b2, w3, b3)


def _reference_bf16(x, adj, params):
    """Plain-JAX reference with the same bf16-operand / f32-accumulate math."""
    w1, b1, w2, b2, w3, b3 = params

    def dot(a, b):
        return jnp.dot(a.astype(jnp.bfloat16), b.astype(jnp.bfloat16),
                       preferred_element_type=jnp.float32)

    h = jnp.maximum(dot(dot(adj, x), w1) + b1, 0.0)    # same (adj@x)@W1 reassociation
    h = jnp.maximum(dot(adj, dot(h, w2)) + b2, 0.0)
    z = dot(adj, dot(h, w3)) + b3
    return jax.nn.log_softmax(z, axis=-1)


def _reference_f32(x, adj, params):
    """Loose full-f32 reference (sanity check for gross semantic errors)."""
    w1, b1, w2, b2, w3, b3 = params
    h = jnp.maximum(adj @ (x @ w1) + b1, 0.0)
    h = jnp.maximum(adj @ (h @ w2) + b2, 0.0)
    h = adj @ (h @ w3) + b3
    return jax.nn.log_softmax(h, axis=-1)


if __name__ == "__main__":
    key = jax.random.PRNGKey(0)
    k_x, k_adj, k_p = jax.random.split(key, 3)

    # Small but tile-friendly problem: N=512 graph nodes, 32 input features,
    # hiddens 128/64 (module defaults), 8 output classes.
    N, F_IN, H1, H2, F_OUT = 512, 32, 128, 64, 8

    x = jax.random.normal(k_x, (N, F_IN), jnp.float32)
    # Sparse-ish symmetric adjacency with self-loops, row-normalized (typical GCN input).
    a = (jax.random.uniform(k_adj, (N, N)) < 0.02).astype(jnp.float32)
    a = jnp.maximum(a, a.T) + jnp.eye(N, dtype=jnp.float32)
    adj = a / jnp.sum(a, axis=-1, keepdims=True)

    params = init_params(k_p, F_IN, F_OUT, H1, H2)

    out = gcn_forward(x, adj, params, tm=256)
    jax.block_until_ready(out)
    assert out.shape == (N, F_OUT)

    ref_bf16 = _reference_bf16(x, adj, params)
    ref_f32 = _reference_f32(x, adj, params)
    assert jnp.allclose(out, ref_bf16, atol=2e-3, rtol=2e-3)
    assert jnp.allclose(out, ref_f32, atol=5e-2, rtol=5e-2)

    print("KERNEL_OK")
</pallas_src>

<mosaic_0001>
module attributes {stable_mosaic.version = 11 : i64} {
  func.func @_gc1_kernel(%arg0: i32, %arg1: memref<256x512xbf16, #tpu.memory_space<vmem>>, %arg2: memref<512x32xbf16, #tpu.memory_space<vmem>>, %arg3: memref<32x128xbf16, #tpu.memory_space<vmem>>, %arg4: memref<1x128xf32, #tpu.memory_space<vmem>>, %arg5: memref<128x64xbf16, #tpu.memory_space<vmem>>, %arg6: memref<256x64xbf16, #tpu.memory_space<vmem>>) attributes {dimension_semantics = [#tpu.dimension_semantics<parallel>], iteration_bounds = array<i64: 2>, scalar_prefetch = 0 : i64, scratch_operands = 0 : i64, tpu.core_type = #tpu.core_type<tc>, window_params = [{transform_indices = @transform_0, window_bounds = array<i64: 256, 512>}, {pipeline_mode = #tpu.pipeline_mode<synchronous>, transform_indices = @transform_1, window_bounds = array<i64: 512, 32>}, {pipeline_mode = #tpu.pipeline_mode<synchronous>, transform_indices = @transform_2, window_bounds = array<i64: 32, 128>}, {pipeline_mode = #tpu.pipeline_mode<synchronous>, transform_indices = @transform_3, window_bounds = array<i64: 1, 128>}, {pipeline_mode = #tpu.pipeline_mode<synchronous>, transform_indices = @transform_4, window_bounds = array<i64: 128, 64>}, {transform_indices = @transform_5, window_bounds = array<i64: 256, 64>}]} {
    %c0 = arith.constant 0 : index
    %c0_0 = arith.constant 0 : index
    %0 = vector.load %arg1[%c0, %c0_0] : memref<256x512xbf16, #tpu.memory_space<vmem>>, vector<256x512xbf16>
    %c0_1 = arith.constant 0 : index
    %c0_2 = arith.constant 0 : index
    %1 = vector.load %arg2[%c0_1, %c0_2] : memref<512x32xbf16, #tpu.memory_space<vmem>>, vector<512x32xbf16>
    %cst = arith.constant dense<0.000000e+00> : vector<256x32xf32>
    %2 = tpu.matmul %0, %1, %cst {dimension_numbers = #tpu.dot_dimension_numbers<[1], [0], [0], [1], [0, 0, 1, 1], [], []>} : vector<256x512xbf16>, vector<512x32xbf16>, vector<256x32xf32> -> vector<256x32xf32>
    %3 = arith.truncf %2 : vector<256x32xf32> to vector<256x32xbf16>
    %c0_3 = arith.constant 0 : index
    %c0_4 = arith.constant 0 : index
    %4 = vector.load %arg3[%c0_3, %c0_4] : memref<32x128xbf16, #tpu.memory_space<vmem>>, vector<32x128xbf16>
    %cst_5 = arith.constant dense<0.000000e+00> : vector<256x128xf32>
    %5 = tpu.matmul %3, %4, %cst_5 {dimension_numbers = #tpu.dot_dimension_numbers<[1], [0], [0], [1], [0, 0, 1, 1], [], []>} : vector<256x32xbf16>, vector<32x128xbf16>, vector<256x128xf32> -> vector<256x128xf32>
    %c0_6 = arith.constant 0 : index
    %c0_7 = arith.constant 0 : index
    %6 = vector.load %arg4[%c0_6, %c0_7] : memref<1x128xf32, #tpu.memory_space<vmem>>, vector<1x128xf32>
    %7 = vector.broadcast %6 : vector<1x128xf32> to vector<256x128xf32>
    %8 = arith.addf %5, %7 : vector<256x128xf32>
    %cst_8 = arith.constant 0.000000e+00 : f32
    %9 = vector.broadcast %cst_8 : f32 to vector<256x128xf32>
    %10 = arith.maximumf %8, %9 : vector<256x128xf32>
    %11 = arith.truncf %10 : vector<256x128xf32> to vector<256x128xbf16>
    %c0_9 = arith.constant 0 : index
    %c0_10 = arith.constant 0 : index
    %12 = vector.load %arg5[%c0_9, %c0_10] : memref<128x64xbf16, #tpu.memory_space<vmem>>, vector<128x64xbf16>
    %cst_11 = arith.constant dense<0.000000e+00> : vector<256x64xf32>
    %13 = tpu.matmul %11, %12, %cst_11 {dimension_numbers = #tpu.dot_dimension_numbers<[1], [0], [0], [1], [0, 0, 1, 1], [], []>} : vector<256x128xbf16>, vector<128x64xbf16>, vector<256x64xf32> -> vector<256x64xf32>
    %14 = arith.truncf %13 : vector<256x64xf32> to vector<256x64xbf16>
    %c0_12 = arith.constant 0 : index
    %c0_13 = arith.constant 0 : index
    %15 = vector.load %arg6[%c0_12, %c0_13] : memref<256x64xbf16, #tpu.memory_space<vmem>>, vector<256x64xbf16>
    tpu.vector_store %arg6[%c0_12, %c0_13], %14 {strides = array<i32>} : memref<256x64xbf16, #tpu.memory_space<vmem>>, vector<256x64xbf16>,
    return
  }
  func.func @transform_0(%arg0: i32) -> (i32, i32) {
    %c0_i32 = arith.constant 0 : i32
    %c0_i32_0 = arith.constant 0 : i32
    return %arg0, %c0_i32 : i32, i32
  }
  func.func @transform_1(%arg0: i32) -> (i32, i32) {
    %c0_i32 = arith.constant 0 : i32
    %c0_i32_0 = arith.constant 0 : i32
    %c0_i32_1 = arith.constant 0 : i32
    return %c0_i32, %c0_i32_0 : i32, i32
  }
  func.func @transform_2(%arg0: i32) -> (i32, i32) {
    %c0_i32 = arith.constant 0 : i32
    %c0_i32_0 = arith.constant 0 : i32
    %c0_i32_1 = arith.constant 0 : i32
    return %c0_i32, %c0_i32_0 : i32, i32
  }
  func.func @transform_3(%arg0: i32) -> (i32, i32) {
    %c0_i32 = arith.constant 0 : i32
    %c0_i32_0 = arith.constant 0 : i32
    %c0_i32_1 = arith.constant 0 : i32
    return %c0_i32, %c0_i32_0 : i32, i32
  }
  func.func @transform_4(%arg0: i32) -> (i32, i32) {
    %c0_i32 = arith.constant 0 : i32
    %c0_i32_0 = arith.constant 0 : i32
    %c0_i32_1 = arith.constant 0 : i32
    return %c0_i32, %c0_i32_0 : i32, i32
  }
  func.func @transform_5(%arg0: i32) -> (i32, i32) {
    %c0_i32 = arith.constant 0 : i32
    %c0_i32_0 = arith.constant 0 : i32
    return %arg0, %c0_i32 : i32, i32
  }
}

</mosaic_0001>

<bundles_post_ra>
// kernel: tpu_custom_call.1
= control target key start
LH: loop header
LB: loop body
LE: loop exit
PB: predicated region body
PF: predicated region fallthrough
CT: control target
= control target key end

     0   :  { %10 = vsyncpa [#allocation3], 0  ;;  %s2986_s0 = inlined_call_operand.hbm [shape: bf16[512,512], index: 0, kind: input, shape index: {}]   ;;  %s2987_s1 = inlined_call_operand.vmem [shape: bf16[512,32], index: 1, kind: input, shape index: {}]   ;;  %s2988_s2 = inlined_call_operand.vmem [shape: bf16[32,128], index: 2, kind: input, shape index: {}]   ;;  %s2989_s3 = inlined_call_operand.vmem [shape: f32[1,128], index: 3, kind: input, shape index: {}]   ;;  %s2990_s4 = inlined_call_operand.vmem [shape: bf16[128,64], index: 4, kind: input, shape index: {}]   ;;  %s2991_s5 = inlined_call_operand.vmem [shape: bf16[512,64], index: 5, kind: output, shape index: {}]  }
   0x1   :  { %12 = vsyncpa [#allocation3 + $0x1], 0  ;;  %s2472_s18 = smov 0   ;;  %s2474_s19 = smov 0  }
   0x2   :  { %s2476_s20 = smov 0   ;;  %s2478_s21 = smov 0  }
   0x3 LB: > { %s1754_s22 = sadd.s32 4294967295, %s2438_s21   ;;  %s2492_s23 = sadd.s32 1, %s2438_s21   ;;  %s2438_s21 = sphi %s2478_s21, %s2998_s21   ;;  %s2434_s20 = sphi %s2476_s20, %s2997_s20   ;;  %s2430_s19 = sphi %s2474_s19, %s2996_s19   ;;  %s2426_s18 = sphi %s2472_s18, %s2995_s18  }
   0x4   : > { %s22_s24 = ssub.s32 %s2438_s21, %s2492_s23  ;;  %s25_s25 = sadd.s32 1, %s2434_s20 }
   0x5   : > { %p23_p0 = scmp.eq.s32.totalorder %s22_s24, 0  ;;  %p32_p1 = scmp.ne.s32.totalorder %s2434_s20, %s2430_s19 }
   0x6   : > { %p33_p2 = scmp.eq.s32.totalorder %s2438_s21, 0  ;;  %p38_p3 = scmp.ne.s32.totalorder %s2430_s19, %s2426_s18 }
   0x7   : > { %s2502_s26 = scalar_select %p23_p0, %s2434_s20, %s25_s25  }
   0x8   : > { %p2504_p4 = por %p33_p2, %p32_p1  ;;  %p39_p5 = scmp.eq.s32.totalorder %s1754_s22, 0 }
   0x9   : > { %p2338_p6 = scmp.lt.s32.totalorder %s2438_s21, 2  ;;  %s184_s29 = sand.u32 1, %s2434_s20  }
   0xa   : > { %p2511_p7 = por %p39_p5, %p38_p3  ;;  %s1758_s30 = sshll.u32 %s184_s29, 9 }
   0xb   : > { %s2209_s6 = sshll.u32 %s2438_s21, 9  ;;  %s188_s10 = scalar_lea.vmem [#allocation2], %s1758_s30 }
   0xc   : > { %s194_s9 = scalar_lea.hbm %s2986_s0, %s2209_s6  ;;  %s197_s11 = sshll.u32 %s188_s10, 4  ;;  %s198_s11 = int_to_ptr.vmem [resolvable:$true] %s197_s11 }
   0xd   : > { %s195_s12 = sshll.u32 %s194_s9, 4  ;;  %p2522_p8 = pnand %p2338_p6, %p2504_p4  ;;  %s196_s12 = int_to_ptr.hbm [resolvable:$true] %s195_s12 }
   0xe   : > { %p1762_p9 = scmp.ge.s32.totalorder %s2438_s21, 1  ;;  %s185_s14 = scalar_lea.sflag [#allocation3], %s184_s29 }
   0xf   : > { %s2374_s15 = sshra.s32 %s196_s12, 4  ;;  %p2378_p11 = pneg %p2522_p8  ;;  %s2375_s15 = int_to_ptr.hbm [resolvable:$true] %s2374_s15 }
  0x10   : > { %s2376_s16 = scalar_lea.hbm %s2375_s15, 512  ;;  %s2381_s24 = scalar_lea.hbm %s2986_s0, 1024 }
  0x11   : > { %p2377_p10 = scmp.ne.s32.totalorder %s2375_s15, %s2376_s16  ;;  %p2382_p0 = scmp.lt.s32.totalorder %s2375_s15, %s2986_s0 }
  0x12   : > { %p2383_p1 = scmp.lt.s32.totalorder %s2381_s24, %s2376_s16 }
  0x13   : > { %p2379_p12 = pnand %p2378_p11, %p2377_p10 }
  0x14   : > { %p2384_p2 = por %p2383_p1, %p2382_p0 }
  0x15   : > { %p2380_p13 = pneg %p2379_p12 }
  0x17   : > { %p2385_p3 = pnand %p2384_p2, %p2380_p13 }
  0x19   : > { %2388 = shalt.err (!%p2385_p3)
}
  0x1a   : > { %s2440_s29 = smov 256   ;;  %s2441_s30 = smov 16  }
  0x1b   : > { %2337 = dma.hbm_to_vmem [thread:$0]  (!%p2522_p8), %s196_s12, 8192, %s198_s11, %s185_s14, %s2440_s29, %s2440_s29, %s2441_s30  }
  0x1c   : > { %p205_p4 = scmp.lt.s32.totalorder %s2438_s21, 3 }
  0x1e   : > { %p206_p5 = pnand %p1762_p9, %p205_p4 }
  0x1f   : > { %s211_s6 = sand.u32 (!%p206_p5), 1, %s2430_s19  }
  0x20   : > { %209 = sbr.rel (%p206_p5) target bundleno = 861 (0x35d), region = 40  ;;  %s1763_s7 = sshll.u32 (!%p206_p5), %s211_s6, 9 }
  0x21   : > { %s212_s8 = scalar_lea.sflag (!%p206_p5), [#allocation3], %s211_s6  ;;  %s2541_s9 = scalar_lea.vmem (!%p206_p5), [#allocation2], %s1763_s7 }
  0x25   : > { %2421 = dma.done.wait (%p2511_p7), %s212_s8, 8192  }
  0x26   : > { %2423 = vsyncadd (%p2511_p7), %s212_s8, 4294959104  ;;  %v2281_v0 = vld [vmem:[%s2987_s1 + $0x38] sm:$0xff]  ;;  %v2280_v2 = vld [vmem:[%s2987_s1 + $0x30] sm:$0xff]  ;;  %vm1283_vm0 = vcmask 261120   ;;  %s1764_s29 = sshll.u32 %s1754_s22, 5  ;;  %vm1654_vm1 = vcmask 519168  }
  0x27   : > { %v2289_v1 = vld [vmem:[%s2987_s1 + $0x78] sm:$0xff]  ;;  %2316 = vmatpush.bf16.msra.mxu2 %v2281_v0  ;;  %v2288_v3 = vld [vmem:[%s2987_s1 + $0x70] sm:$0xff]  ;;  %891 = vmatpush.bf16.msra.mxu0 %v2281_v0  ;;  %v2279_v4 = vld [vmem:[%s2987_s1 + $0x28] sm:$0xff]  ;;  %p245_p6 = scmp.lt.s32.totalorder %s1764_s29, 63 }
  0x28   : > { %2324 = vmatpush.bf16.msra.mxu3 %v2289_v1  ;;  %980 = vmatpush.bf16.msra.mxu1 %v2289_v1  ;;  %v2287_v5 = vld [vmem:[%s2987_s1 + $0x68] sm:$0xff]  ;;  %v2278_v6 = vld [vmem:[%s2987_s1 + $0x20] sm:$0xff]  ;;  %v2277_v8 = vld [vmem:[%s2987_s1 + $0x18] sm:$0xff] }
  0x29   : > { %v2286_v7 = vld [vmem:[%s2987_s1 + $0x60] sm:$0xff]  ;;  %v2285_v9 = vld [vmem:[%s2987_s1 + $0x58] sm:$0xff]  ;;  %v2276_v10 = vld [vmem:[%s2987_s1 + $0x10] sm:$0xff]  ;;  %s3000_s29 = smov (!%p245_p6, %s1764_s29), 63 }
  0x2a   : > { %v2284_v11 = vld [vmem:[%s2987_s1 + $0x50] sm:$0xff]  ;;  %v2275_v12 = vld [vmem:[%s2987_s1 + $0x8] sm:$0xff]  ;;  %v2274_v14 = vld [vmem:[%s2987_s1] sm:$0xff]  ;;  %s1765_s30 = sshll.u32 %s3000_s29, 2 }
  0x2b   : > { %2317 = vmatpush.bf16.msra.mxu2 %v2280_v2  ;;  %892 = vmatpush.bf16.msra.mxu0 %v2280_v2  ;;  %v2283_v13 = vld [vmem:[%s2987_s1 + $0x48] sm:$0xff]  ;;  %v2282_v15 = vld [vmem:[%s2987_s1 + $0x40] sm:$0xff]  ;;  %v2244_v17 = vld [vmem:[%s2541_s9 + $0x10c] sm:$0xf0]  ;;  %s2893_s8 = scalar_lea.vmem %s2991_s5, %s1765_s30 }
  0x2c   : > { %2325 = vmatpush.bf16.msra.mxu3 %v2288_v3  ;;  %981 = vmatpush.bf16.msra.mxu1 %v2288_v3  ;;  %v1896_v16 = vld [vmem:[%s2541_s9 + $0x100] sm:$0xf]  ;;  %v2242_v18 = vld [vmem:[%s2541_s9 + $0x104] sm:$0xf]  ;;  %v1898_v19 = vld [vmem:[%s2541_s9 + $0x110] sm:$0xf0] }
  0x2d   : > { %v2297_v20 = vld [vmem:[%s2987_s1 + $0xb8] sm:$0xff]  ;;  %v1897_v22 = vor.u32 %v2244_v17, %v1896_v16  ;;  %v1901_v23 = vor.u32 %v2242_v18, %v1898_v19  ;;  %v2296_v24 = vld [vmem:[%s2987_s1 + $0xb0] sm:$0xff]  ;;  %v2295_v26 = vld [vmem:[%s2987_s1 + $0xa8] sm:$0xff] }
  0x2e   : > { %v2305_v21 = vld [vmem:[%s2987_s1 + $0xf8] sm:$0xff]  ;;  %v2304_v25 = vld [vmem:[%s2987_s1 + $0xf0] sm:$0xff]  ;;  %v2303_v27 = vld [vmem:[%s2987_s1 + $0xe8] sm:$0xff] }
  0x2f   : > { %2318 = vmatpush.bf16.msra.mxu2 %v2279_v4  ;;  %893 = vmatpush.bf16.msra.mxu0 %v2279_v4  ;;  %v1912_v28 = vld [vmem:[%s2541_s9 + $0x120] sm:$0xf]  ;;  %v2248_v29 = vld [vmem:[%s2541_s9 + $0x12c] sm:$0xf0]  ;;  %v2246_v30 = vld [vmem:[%s2541_s9 + $0x124] sm:$0xf] }
  0x30   : > { %2326 = vmatpush.bf16.msra.mxu3 %v2287_v5  ;;  %982 = vmatpush.bf16.msra.mxu1 %v2287_v5  ;;  %v1914_v31 = vld [vmem:[%s2541_s9 + $0x130] sm:$0xf0]  ;;  %v1913_v32 = vor.u32 %v2248_v29, %v1912_v28  ;;  %v2294_v34 = vld [vmem:[%s2987_s1 + $0xa0] sm:$0xff]  ;;  %v2252_v37 = vld [vmem:[%s2541_s9 + $0x14c] sm:$0xf0] }
  0x31   : > { %v1917_v33 = vor.u32 %v2246_v30, %v1914_v31  ;;  %v2302_v35 = vld [vmem:[%s2987_s1 + $0xe0] sm:$0xff]  ;;  %v1930_v39 = vld [vmem:[%s2541_s9 + $0x150] sm:$0xf0]  ;;  %v2293_v42 = vld [vmem:[%s2987_s1 + $0x98] sm:$0xff] }
  0x32   : > { %v1928_v36 = vld [vmem:[%s2541_s9 + $0x140] sm:$0xf]  ;;  %v2250_v38 = vld [vmem:[%s2541_s9 + $0x144] sm:$0xf]  ;;  %v2301_v43 = vld [vmem:[%s2987_s1 + $0xd8] sm:$0xff] }
  0x33   : > { %2319 = vmatpush.bf16.msra.mxu2 %v2278_v6  ;;  %894 = vmatpush.bf16.msra.mxu0 %v2278_v6  ;;  %v1929_v40 = vor.u32 %v2252_v37, %v1928_v36  ;;  %v1933_v41 = vor.u32 %v2250_v38, %v1930_v39  ;;  %v1944_v44 = vld [vmem:[%s2541_s9 + $0x160] sm:$0xf]  ;;  %v2256_v45 = vld [vmem:[%s2541_s9 + $0x16c] sm:$0xf0]  ;;  %v2254_v46 = vld [vmem:[%s2541_s9 + $0x164] sm:$0xf] }
  0x34   : > { %2327 = vmatpush.bf16.msra.mxu3 %v2286_v7  ;;  %983 = vmatpush.bf16.msra.mxu1 %v2286_v7  ;;  %v1946_v47 = vld [vmem:[%s2541_s9 + $0x170] sm:$0xf0]  ;;  %v1945_v48 = vor.u32 %v2256_v45, %v1944_v44  ;;  %v1960_v52 = vld [vmem:[%s2541_s9 + $0x180] sm:$0xf]  ;;  %v2260_v53 = vld [vmem:[%s2541_s9 + $0x18c] sm:$0xf0] }
  0x35   : > { %v1949_v49 = vor.u32 %v2254_v46, %v1946_v47  ;;  %v2292_v50 = vld [vmem:[%s2987_s1 + $0x90] sm:$0xff]  ;;  %v2258_v54 = vld [vmem:[%s2541_s9 + $0x184] sm:$0xf]  ;;  %v1961_v56 = vor.u32 %v2260_v53, %v1960_v52  ;;  %v2291_v58 = vld [vmem:[%s2987_s1 + $0x88] sm:$0xff] }
  0x36   : > { %v2300_v51 = vld [vmem:[%s2987_s1 + $0xd0] sm:$0xff]  ;;  %v2299_v59 = vld [vmem:[%s2987_s1 + $0xc8] sm:$0xff]  ;;  %v1976_v60 = vld [vmem:[%s2541_s9 + $0x1a0] sm:$0xf] }
  0x37   : > { %2320 = vmatpush.bf16.msra.mxu2 %v2277_v8  ;;  %895 = vmatpush.bf16.msra.mxu0 %v2277_v8  ;;  %v1962_v55 = vld [vmem:[%s2541_s9 + $0x190] sm:$0xf0]  ;;  %v2264_v61 = vld [vmem:[%s2541_s9 + $0x1ac] sm:$0xf0]  ;;  %v2262_v62 = vld [vmem:[%s2541_s9 + $0x1a4] sm:$0xf] }
  0x38   : > { %2328 = vmatpush.bf16.msra.mxu3 %v2285_v9  ;;  %984 = vmatpush.bf16.msra.mxu1 %v2285_v9  ;;  %v1965_v57 = vor.u32 %v2258_v54, %v1962_v55  ;;  %v1978_v63 = vld [vmem:[%s2541_s9 + $0x1b0] sm:$0xf0]  ;;  %v1977_v0 = vor.u32 %v2264_v61, %v1976_v60  ;;  %v2290_v2 = vld [vmem:[%s2987_s1 + $0x80] sm:$0xff]  ;;  %v2212_v5 = vld [vmem:[%s2541_s9 + $0xc] sm:$0xf0] }
  0x39   : > { %v1981_v1 = vor.u32 %v2262_v62, %v1978_v63  ;;  %v2298_v3 = vld [vmem:[%s2987_s1 + $0xc0] sm:$0xff]  ;;  %v1770_v7 = vld [vmem:[%s2541_s9 + $0x10] sm:$0xf0]  ;;  %v2272_v17 = vld [vmem:[%s2541_s9 + $0x1ec] sm:$0xf0] }
  0x3a   : > { %v1768_v4 = vld [vmem:[%s2541_s9] sm:$0xf]  ;;  %v2210_v6 = vld [vmem:[%s2541_s9 + $0x4] sm:$0xf]  ;;  %v2010_v19 = vld [vmem:[%s2541_s9 + $0x1f0] sm:$0xf0] }
  0x3b   : > { %2321 = vmatpush.bf16.msra.mxu2 %v2276_v10  ;;  %896 = vmatpush.bf16.msra.mxu0 %v2276_v10  ;;  %v1769_v8 = vor.u32 %v2212_v5, %v1768_v4  ;;  %v1773_v9 = vor.u32 %v2210_v6, %v1770_v7  ;;  %v1992_v10 = vld [vmem:[%s2541_s9 + $0x1c0] sm:$0xf]  ;;  %v2270_v18 = vld [vmem:[%s2541_s9 + $0x1e4] sm:$0xf]  ;;  %v2307_v28 = vld [vmem:[%s2988_s2 + $0x8] sm:$0xff] }
  0x3c   : > { %2329 = vmatpush.bf16.msra.mxu3 %v2284_v11  ;;  %985 = vmatpush.bf16.msra.mxu1 %v2284_v11  ;;  %v2268_v11 = vld [vmem:[%s2541_s9 + $0x1cc] sm:$0xf0]  ;;  %v2008_v16 = vld [vmem:[%s2541_s9 + $0x1e0] sm:$0xf]  ;;  %v1776_v29 = vld [vmem:[%s2541_s9 + $0x8] sm:$0xf] }
  0x3d   : > { %v2213_v30 = vld [vmem:[%s2541_s9 + $0x14] sm:$0xf0]  ;;  %v2211_v31 = vld [vmem:[%s2541_s9 + $0xc] sm:$0xf]  ;;  %v1802_v37 = vld [vmem:[%s2541_s9 + $0x50] sm:$0xf0] }
  0x3e   : > { %v1777_v39 = vor.u32 %v2213_v30, %v1776_v29  ;;  %v1792_v44 = vld [vmem:[%s2541_s9 + $0x28] sm:$0xf]  ;;  %v2217_v45 = vld [vmem:[%s2541_s9 + $0x34] sm:$0xf0]  ;;  %v2215_v46 = vld [vmem:[%s2541_s9 + $0x2c] sm:$0xf] }
  0x3f   : > { %2322 = vmatpush.bf16.msra.mxu2 %v2275_v12  ;;  %897 = vmatpush.bf16.msra.mxu0 %v2275_v12  ;;  %v2266_v12 = vld [vmem:[%s2541_s9 + $0x1c4] sm:$0xf]  ;;  %v1794_v47 = vld [vmem:[%s2541_s9 + $0x38] sm:$0xf0]  ;;  %v1818_v52 = vld [vmem:[%s2541_s9 + $0x70] sm:$0xf0] }
  0x40   : > { %2330 = vmatpush.bf16.msra.mxu3 %v2283_v13  ;;  %986 = vmatpush.bf16.msra.mxu1 %v2283_v13  ;;  %v1994_v13 = vld [vmem:[%s2541_s9 + $0x1d0] sm:$0xf0]  ;;  %v1808_v62 = vld [vmem:[%s2541_s9 + $0x48] sm:$0xf]  ;;  %v2221_v63 = vld [vmem:[%s2541_s9 + $0x54] sm:$0xf0] }
  0x41   : > { %v2226_v4 = vld [vmem:[%s2541_s9 + $0x84] sm:$0xf]  ;;  %v1834_v6 = vld [vmem:[%s2541_s9 + $0x90] sm:$0xf0] }
  0x43   : > { %2323 = vmatpush.bf16.msra.mxu2 %v2274_v14  ;;  %898 = vmatpush.bf16.msra.mxu0 %v2274_v14  ;;  %v1993_v14 = vor.u32 %v2268_v11, %v1992_v10  ;;  %v1809_v11 = vor.u32 %v2221_v63, %v1808_v62  ;;  %v2238_v62 = vld [vmem:[%s2541_s9 + $0xe4] sm:$0xf] }
  0x44   : > { %2331 = vmatpush.bf16.msra.mxu3 %v2282_v15  ;;  %987 = vmatpush.bf16.msra.mxu1 %v2282_v15  ;;  %v1997_v15 = vor.u32 %v2266_v12, %v1994_v13 }
  0x46   : > { %939 = vmatmul.bf16.vlgmr.msra.gmra.mxu2 %v1897_v22  ;;  %899 = vmatmul.bf16.vlgmr.msra.gmra.mxu0 %v1769_v8  ;;  %v2214_v22 = vld [vmem:[%s2541_s9 + $0x24] sm:$0xf] }
  0x47   : > { %1069 = vmatpush.bf16.msrb.mxu2 %v2297_v20  ;;  %1028 = vmatmul.bf16.vlgmr.msra.gmra.mxu3 %v1901_v23  ;;  %v1784_v20 = vld [vmem:[%s2541_s9 + $0x20] sm:$0xf] }
  0x48   : > { %1158 = vmatpush.bf16.msrb.mxu3 %v2305_v21  ;;  %988 = vmatmul.bf16.vlgmr.msra.gmra.mxu1 %v1773_v9  ;;  %v2216_v21 = vld [vmem:[%s2541_s9 + $0x2c] sm:$0xf0]  ;;  %v1837_v9 = vor.u32 %v2226_v4, %v1834_v6 }
  0x49   : > { %v1785_v23 = vor.u32 %v2216_v21, %v1784_v20  ;;  %1338 = vmatpush.bf16.msrb.mxu0 %v2307_v28  ;;  %v1848_v20 = vld [vmem:[%s2541_s9 + $0xa0] sm:$0xf]  ;;  %v2232_v21 = vld [vmem:[%s2541_s9 + $0xac] sm:$0xf0] }
  0x4b   : > { %1070 = vmatpush.bf16.msrb.mxu2 %v2296_v24  ;;  %v1786_v24 = vld [vmem:[%s2541_s9 + $0x30] sm:$0xf0] }
  0x4c   : > { %1159 = vmatpush.bf16.msrb.mxu3 %v2304_v25  ;;  %v1789_v25 = vor.u32 %v2214_v22, %v1786_v24  ;;  %v2230_v22 = vld [vmem:[%s2541_s9 + $0xa4] sm:$0xf]  ;;  %v1850_v24 = vld [vmem:[%s2541_s9 + $0xb0] sm:$0xf0] }
  0x4f   : > { %1071 = vmatpush.bf16.msrb.mxu2 %v2295_v26  ;;  %v2009_v26 = vor.u32 %v2272_v17, %v2008_v16  ;;  %v1824_v16 = vld [vmem:[%s2541_s9 + $0x68] sm:$0xf]  ;;  %v2225_v17 = vld [vmem:[%s2541_s9 + $0x74] sm:$0xf0] }
  0x50   : > { %1160 = vmatpush.bf16.msrb.mxu3 %v2303_v27  ;;  %v2013_v27 = vor.u32 %v2270_v18, %v2010_v19  ;;  %v2223_v18 = vld [vmem:[%s2541_s9 + $0x6c] sm:$0xf]  ;;  %v1826_v19 = vld [vmem:[%s2541_s9 + $0x78] sm:$0xf0]  ;;  %v1825_v29 = vor.u32 %v2225_v17, %v1824_v16 }
  0x51   : > { %v1829_v30 = vor.u32 %v2223_v18, %v1826_v19 }
  0x53   : > { %1072 = vmatpush.bf16.msrb.mxu2 %v2294_v34  ;;  %v2220_v34 = vld [vmem:[%s2541_s9 + $0x4c] sm:$0xf0] }
  0x54   : > { %1161 = vmatpush.bf16.msrb.mxu3 %v2302_v35  ;;  %v2218_v35 = vld [vmem:[%s2541_s9 + $0x44] sm:$0xf] }
  0x55   : > { %v1805_v38 = vor.u32 %v2218_v35, %v1802_v37  ;;  %v1840_v35 = vld [vmem:[%s2541_s9 + $0x88] sm:$0xf]  ;;  %v2227_v37 = vld [vmem:[%s2541_s9 + $0x8c] sm:$0xf] }
  0x56   : > { %944 = vmatmul.bf16.gmra.mxu2 %v1913_v32  ;;  %904 = vmatmul.bf16.gmra.mxu0 %v1785_v23  ;;  %v1778_v32 = vld [vmem:[%s2541_s9 + $0x18] sm:$0xf0]  ;;  %v1849_v23 = vor.u32 %v2232_v21, %v1848_v20 }
  0x57   : > { %1033 = vmatmul.bf16.gmra.mxu3 %v1917_v33  ;;  %1073 = vmatpush.bf16.msrb.mxu2 %v2293_v42  ;;  %v1800_v33 = vld [vmem:[%s2541_s9 + $0x40] sm:$0xf] }
  0x58   : > { %1162 = vmatpush.bf16.msrb.mxu3 %v2301_v43  ;;  %993 = vmatmul.bf16.gmra.mxu1 %v1789_v25  ;;  %v1801_v36 = vor.u32 %v2220_v34, %v1800_v33 }
  0x5b   : > { %1074 = vmatpush.bf16.msrb.mxu2 %v2292_v50  ;;  %v2222_v50 = vld [vmem:[%s2541_s9 + $0x64] sm:$0xf] }
  0x5c   : > { %1163 = vmatpush.bf16.msrb.mxu3 %v2300_v51  ;;  %v1821_v55 = vor.u32 %v2222_v50, %v1818_v52 }
  0x5f   : > { %1075 = vmatpush.bf16.msrb.mxu2 %v2291_v58  ;;  %v1797_v58 = vor.u32 %v2215_v46, %v1794_v47 }
  0x60   : > { %1164 = vmatpush.bf16.msrb.mxu3 %v2299_v59 }
  0x63   : > { %1076 = vmatpush.bf16.msrb.mxu2 %v2290_v2  ;;  %v1832_v2 = vld [vmem:[%s2541_s9 + $0x80] sm:$0xf] }
  0x64   : > { %1165 = vmatpush.bf16.msrb.mxu3 %v2298_v3  ;;  %v2228_v3 = vld [vmem:[%s2541_s9 + $0x8c] sm:$0xf0] }
  0x65   : > { %v1833_v5 = vor.u32 %v2228_v3, %v1832_v2 }
  0x66   : > { %949 = vmatmul.bf16.gmra.mxu2 %v1929_v40  ;;  %v1781_v40 = vor.u32 %v2211_v31, %v1778_v32  ;;  %909 = vmatmul.bf16.gmra.mxu0 %v1801_v36  ;;  %v2306_v31 = vld [vmem:[%s2988_s2] sm:$0xff]  ;;  %v2229_v36 = vld [vmem:[%s2541_s9 + $0x94] sm:$0xf0] }
  0x67   : > { %1038 = vmatmul.bf16.gmra.mxu3 %v1933_v41  ;;  %1339 = vmatpush.bf16.msrb.mxu0 %v2306_v31 }
  0x68   : > { %998 = vmatmul.bf16.gmra.mxu1 %v1805_v38  ;;  %v1842_v38 = vld [vmem:[%s2541_s9 + $0x98] sm:$0xf0] }
  0x69   : > { %v1845_v50 = vor.u32 %v2227_v37, %v1842_v38 }
  0x76   : > { %954 = vmatmul.bf16.gmra.mxu2 %v1945_v48  ;;  %v1816_v48 = vld [vmem:[%s2541_s9 + $0x60] sm:$0xf] }
  0x77   : > { %1043 = vmatmul.bf16.gmra.mxu3 %v1949_v49  ;;  %v2224_v49 = vld [vmem:[%s2541_s9 + $0x6c] sm:$0xf0] }
  0x78   : > { %v1817_v51 = vor.u32 %v2224_v49, %v1816_v48  ;;  %1003 = vmatmul.bf16.gmra.mxu1 %v1821_v55  ;;  %v1841_v49 = vor.u32 %v2229_v36, %v1840_v35  ;;  %v2233_v55 = vld [vmem:[%s2541_s9 + $0xb4] sm:$0xf0] }
  0x7a   : > { %914 = vmatmul.bf16.gmra.mxu0 %v1817_v51 }
  0x86   : > { %959 = vmatmul.bf16.gmra.mxu2 %v1961_v56 }
  0x87   : > { %1048 = vmatmul.bf16.gmra.mxu3 %v1965_v57  ;;  %v1793_v57 = vor.u32 %v2217_v45, %v1792_v44  ;;  %v1866_v44 = vld [vmem:[%s2541_s9 + $0xd0] sm:$0xf0] }
  0x88   : > { %1008 = vmatmul.bf16.gmra.mxu1 %v1837_v9 }
  0x8a   : > { %919 = vmatmul.bf16.gmra.mxu0 %v1833_v5 }
  0x96   : > { %964 = vmatmul.bf16.gmra.mxu2 %v1977_v0  ;;  %v2219_v0 = vld [vmem:[%s2541_s9 + $0x4c] sm:$0xf] }
  0x97   : > { %1053 = vmatmul.bf16.gmra.mxu3 %v1981_v1  ;;  %v1810_v1 = vld [vmem:[%s2541_s9 + $0x58] sm:$0xf0] }
  0x98   : > { %v1813_v12 = vor.u32 %v2219_v0, %v1810_v1  ;;  %v1882_v0 = vld [vmem:[%s2541_s9 + $0xf0] sm:$0xf0] }
  0x99   : > { %v1885_v3 = vor.u32 %v2238_v62, %v1882_v0  ;;  %v1920_v0 = vld [vmem:[%s2541_s9 + $0x128] sm:$0xf] }
  0x9a   : > { %924 = vmatmul.bf16.gmra.mxu0 %v1849_v23 }
  0xa6   : > { %969 = vmatmul.bf16.gmra.mxu2 %v1993_v14 }
  0xa7   : > { %1058 = vmatmul.bf16.gmra.mxu3 %v1997_v15 }
  0xb6   : > { %974 = vmatmul.bf16.gmra.mxu2 %v2009_v26 }
  0xb7   : > { %1063 = vmatmul.bf16.gmra.mxu3 %v2013_v27  ;;  %v1853_v27 = vor.u32 %v2230_v22, %v1850_v24 }
  0xb9   : > { %1013 = vmatmul.bf16.gmra.mxu1 %v1853_v27  ;;  %v2241_v27 = vld [vmem:[%s2541_s9 + $0xf4] sm:$0xf0] }
  0xc3   : > { %v900_v21 = vpop.f32.mrf.mxu0 }
  0xc5   : > { %v989_v22 = vpop.f32.mrf.mxu1 }
  0xc6   : > { %1077 = vmatmul.bf16.vlgmr.msrb.gmra.mxu2 %v1777_v39  ;;  %v1864_v39 = vld [vmem:[%s2541_s9 + $0xc0] sm:$0xf] }
  0xc7   : > { %1166 = vmatmul.bf16.vlgmr.msrb.gmra.mxu3 %v1781_v40  ;;  %v2236_v40 = vld [vmem:[%s2541_s9 + $0xcc] sm:$0xf0] }
  0xc9   : > { %v940_v41 = vpop.f32.mrf.mxu2 }
  0xca   : > { %v1029_v42 = vpop.f32.mrf.mxu3 }
  0xcb   : > { %v2694_v43 = vadd.f32 %v1029_v42, %v940_v41  ;;  %v2234_v41 = vld [vmem:[%s2541_s9 + $0xc4] sm:$0xf]  ;;  %v1865_v42 = vor.u32 %v2236_v40, %v1864_v39  ;;  %v902_v31 = vpop.f32.mrf.mxu0 }
  0xcc   : > { %v1869_v47 = vor.u32 %v2234_v41, %v1866_v44 }
  0xcd   : > { %929 = vmatmul.bf16.gmra.mxu0 %v1865_v42 }
  0xce   : > { %1018 = vmatmul.bf16.gmra.mxu1 %v1869_v47  ;;  %v2243_v47 = vld [vmem:[%s2541_s9 + $0x10c] sm:$0xf] }
  0xd1   : > { %v942_v53 = vpop.f32.mrf.mxu2 }
  0xd2   : > { %v1031_v54 = vpop.f32.mrf.mxu3 }
  0xd3   : > { %v2704_v56 = vadd.f32 %v1031_v54, %v942_v53  ;;  %v1856_v54 = vld [vmem:[%s2541_s9 + $0xa8] sm:$0xf]  ;;  %v905_v42 = vpop.f32.mrf.mxu0 }
  0xd4   : > { %v1857_v5 = vor.u32 %v2233_v55, %v1856_v54 }
  0xd6   : > { %1082 = vmatmul.bf16.gmra.mxu2 %v1793_v57  ;;  %v2231_v57 = vld [vmem:[%s2541_s9 + $0xac] sm:$0xf] }
  0xd7   : > { %1171 = vmatmul.bf16.gmra.mxu3 %v1797_v58  ;;  %v1858_v58 = vld [vmem:[%s2541_s9 + $0xb8] sm:$0xf0] }
  0xd8   : > { %v1861_v6 = vor.u32 %v2231_v57, %v1858_v58 }
  0xd9   : > { %v945_v59 = vpop.f32.mrf.mxu2 }
  0xda   : > { %v1034_v60 = vpop.f32.mrf.mxu3 }
  0xdb   : > { %v2706_v61 = vadd.f32 %v1034_v60, %v945_v59  ;;  %v1880_v59 = vld [vmem:[%s2541_s9 + $0xe0] sm:$0xf]  ;;  %v2240_v60 = vld [vmem:[%s2541_s9 + $0xec] sm:$0xf0]  ;;  %v907_v57 = vpop.f32.mrf.mxu0 }
  0xdc   : > { %v1881_v63 = vor.u32 %v2240_v60, %v1880_v59  ;;  %v2315_v59 = vld [vmem:[%s2990_s4 + $0x38] sm:$0xff] }
  0xdd   : > { %1533 = vmatpush.bf16.msrb.mxu1 %v2315_v59  ;;  %v1952_v59 = vld [vmem:[%s2541_s9 + $0x168] sm:$0xf] }
  0xde   : > { %934 = vmatmul.bf16.gmra.mxu0 %v1881_v63  ;;  %1023 = vmatmul.bf16.gmra.mxu1 %v1885_v3  ;;  %v990_v63 = vadd.f32 %v989_v22, %v900_v21  ;;  %v2249_v3 = vld [vmem:[%s2541_s9 + $0x134] sm:$0xf0]  ;;  %v2314_v21 = vld [vmem:[%s2990_s4 + $0x30] sm:$0xff] }
  0xe1   : > { %v947_v7 = vpop.f32.mrf.mxu2  ;;  %1534 = vmatpush.bf16.msrb.mxu1 %v2314_v21  ;;  %v1968_v21 = vld [vmem:[%s2541_s9 + $0x188] sm:$0xf] }
  0xe2   : > { %v1036_v8 = vpop.f32.mrf.mxu3 }
  0xe3   : > { %v2716_v10 = vadd.f32 %v1036_v8, %v947_v7 }
  0xe6   : > { %1087 = vmatmul.bf16.gmra.mxu2 %v1809_v11  ;;  %v1872_v11 = vld [vmem:[%s2541_s9 + $0xc8] sm:$0xf] }
  0xe7   : > { %1176 = vmatmul.bf16.gmra.mxu3 %v1813_v12  ;;  %v2237_v12 = vld [vmem:[%s2541_s9 + $0xd4] sm:$0xf0] }
  0xe8   : > { %v1873_v19 = vor.u32 %v2237_v12, %v1872_v11 }
  0xe9   : > { %v950_v13 = vpop.f32.mrf.mxu2 }
  0xea   : > { %v1039_v14 = vpop.f32.mrf.mxu3 }
  0xeb   : > { %v2718_v15 = vadd.f32 %v1039_v14, %v950_v13  ;;  %v2235_v13 = vld [vmem:[%s2541_s9 + $0xcc] sm:$0xf]  ;;  %v1874_v14 = vld [vmem:[%s2541_s9 + $0xd8] sm:$0xf0] }
  0xec   : > { %v1877_v20 = vor.u32 %v2235_v13, %v1874_v14  ;;  %v1921_v14 = vor.u32 %v2249_v3, %v1920_v0 }
  0xf1   : > { %v952_v25 = vpop.f32.mrf.mxu2 }
  0xf2   : > { %v1041_v26 = vpop.f32.mrf.mxu3 }
  0xf3   : > { %v2728_v28 = vadd.f32 %v1041_v26, %v952_v25  ;;  %v1888_v26 = vld [vmem:[%s2541_s9 + $0xe8] sm:$0xf] }
  0xf4   : > { %v1889_v37 = vor.u32 %v2241_v27, %v1888_v26 }
  0xf6   : > { %1092 = vmatmul.bf16.gmra.mxu2 %v1825_v29  ;;  %v2239_v29 = vld [vmem:[%s2541_s9 + $0xec] sm:$0xf] }
  0xf7   : > { %1181 = vmatmul.bf16.gmra.mxu3 %v1829_v30  ;;  %v1890_v30 = vld [vmem:[%s2541_s9 + $0xf8] sm:$0xf0] }
  0xf8   : > { %v1893_v38 = vor.u32 %v2239_v29, %v1890_v30  ;;  %v1936_v29 = vld [vmem:[%s2541_s9 + $0x148] sm:$0xf]  ;;  %v2253_v30 = vld [vmem:[%s2541_s9 + $0x154] sm:$0xf0] }
  0xf9   : > { %v955_v32 = vpop.f32.mrf.mxu2 }
  0xfa   : > { %v1044_v33 = vpop.f32.mrf.mxu3 }
  0xfb   : > { %v2733_v34 = vadd.f32 %v1044_v33, %v955_v32  ;;  %v991_v32 = vpop.f32.mrf.mxu1 }
 0x101   : > { %v957_v45 = vpop.f32.mrf.mxu2 }
 0x102   : > { %v1046_v46 = vpop.f32.mrf.mxu3 }
 0x103   : > { %v2743_v48 = vadd.f32 %v1046_v46, %v957_v45  ;;  %v994_v44 = vpop.f32.mrf.mxu1  ;;  %v1904_v45 = vld [vmem:[%s2541_s9 + $0x108] sm:$0xf]  ;;  %v2245_v46 = vld [vmem:[%s2541_s9 + $0x114] sm:$0xf0] }
 0x104   : > { %v1905_v54 = vor.u32 %v2245_v46, %v1904_v45  ;;  %v995_v27 = vadd.f32 %v994_v44, %v905_v42  ;;  %v2313_v44 = vld [vmem:[%s2990_s4 + $0x28] sm:$0xff] }
 0x105   : > { %1535 = vmatpush.bf16.msrb.mxu1 %v2313_v44  ;;  %v1984_v44 = vld [vmem:[%s2541_s9 + $0x1a8] sm:$0xf] }
 0x106   : > { %1097 = vmatmul.bf16.gmra.mxu2 %v1841_v49  ;;  %v1906_v49 = vld [vmem:[%s2541_s9 + $0x118] sm:$0xf0] }
 0x107   : > { %1186 = vmatmul.bf16.gmra.mxu3 %v1845_v50  ;;  %v1909_v55 = vor.u32 %v2243_v47, %v1906_v49 }
 0x109   : > { %v960_v51 = vpop.f32.mrf.mxu2 }
 0x10a   : > { %v1049_v52 = vpop.f32.mrf.mxu3 }
 0x10b   : > { %v2745_v53 = vadd.f32 %v1049_v52, %v960_v51  ;;  %v996_v58 = vpop.f32.mrf.mxu1 }
 0x111   : > { %v962_v1 = vpop.f32.mrf.mxu2 }
 0x112   : > { %v1051_v2 = vpop.f32.mrf.mxu3 }
 0x113   : > { %v2755_v4 = vadd.f32 %v1051_v2, %v962_v1  ;;  %v910_v1 = vpop.f32.mrf.mxu0  ;;  %v999_v2 = vpop.f32.mrf.mxu1 }
 0x116   : > { %1102 = vmatmul.bf16.gmra.mxu2 %v1857_v5  ;;  %v2247_v5 = vld [vmem:[%s2541_s9 + $0x12c] sm:$0xf] }
 0x117   : > { %1191 = vmatmul.bf16.gmra.mxu3 %v1861_v6  ;;  %v1922_v6 = vld [vmem:[%s2541_s9 + $0x138] sm:$0xf0] }
 0x119   : > { %v965_v7 = vpop.f32.mrf.mxu2 }
 0x11a   : > { %v1054_v8 = vpop.f32.mrf.mxu3 }
 0x11b   : > { %v2757_v9 = vadd.f32 %v1054_v8, %v965_v7  ;;  %v992_v7 = vadd.f32 %v991_v32, %v902_v31  ;;  %v912_v22 = vpop.f32.mrf.mxu0  ;;  %v2251_v31 = vld [vmem:[%s2541_s9 + $0x14c] sm:$0xf]  ;;  %v1938_v32 = vld [vmem:[%s2541_s9 + $0x158] sm:$0xf0] }
 0x11c   : > { %v1941_v45 = vor.u32 %v2251_v31, %v1938_v32 }
 0x121   : > { %v967_v16 = vpop.f32.mrf.mxu2 }
 0x122   : > { %v1056_v17 = vpop.f32.mrf.mxu3 }
 0x123   : > { %v2763_v18 = vadd.f32 %v1056_v17, %v967_v16  ;;  %v1925_v16 = vor.u32 %v2247_v5, %v1922_v6  ;;  %v915_v46 = vpop.f32.mrf.mxu0 }
 0x126   : > { %1107 = vmatmul.bf16.gmra.mxu2 %v1873_v19 }
 0x127   : > { %1196 = vmatmul.bf16.gmra.mxu3 %v1877_v20 }
 0x129   : > { %v970_v23 = vpop.f32.mrf.mxu2 }
 0x12a   : > { %v1059_v24 = vpop.f32.mrf.mxu3 }
 0x12b   : > { %v2765_v25 = vadd.f32 %v1059_v24, %v970_v23  ;;  %v1001_v23 = vpop.f32.mrf.mxu1 }
 0x12c   : > { %v1002_v0 = vadd.f32 %v1001_v23, %v912_v22  ;;  %v2261_v22 = vld [vmem:[%s2541_s9 + $0x194] sm:$0xf0]  ;;  %v2259_v23 = vld [vmem:[%s2541_s9 + $0x18c] sm:$0xf] }
 0x131   : > { %v972_v33 = vpop.f32.mrf.mxu2 }
 0x132   : > { %v1061_v35 = vpop.f32.mrf.mxu3 }
 0x133   : > { %v2771_v36 = vadd.f32 %v1061_v35, %v972_v33  ;;  %v997_v33 = vadd.f32 %v996_v58, %v907_v57  ;;  %v1004_v47 = vpop.f32.mrf.mxu1  ;;  %v917_v57 = vpop.f32.mrf.mxu0 }
 0x136   : > { %1112 = vmatmul.bf16.gmra.mxu2 %v1889_v37 }
 0x137   : > { %1201 = vmatmul.bf16.gmra.mxu3 %v1893_v38 }
 0x139   : > { %v975_v39 = vpop.f32.mrf.mxu2 }
 0x13a   : > { %v1064_v40 = vpop.f32.mrf.mxu3 }
 0x13b   : > { %v2773_v41 = vadd.f32 %v1064_v40, %v975_v39  ;;  %v1937_v40 = vor.u32 %v2253_v30, %v1936_v29  ;;  %v1006_v58 = vpop.f32.mrf.mxu1 }
 0x141   : > { %v977_v50 = vpop.f32.mrf.mxu2 }
 0x142   : > { %v1066_v51 = vpop.f32.mrf.mxu3 }
 0x143   : > { %v2779_v52 = vadd.f32 %v1066_v51, %v977_v50 }
 0x146   : > { %1117 = vmatmul.bf16.gmra.mxu2 %v1905_v54 }
 0x147   : > { %1206 = vmatmul.bf16.gmra.mxu3 %v1909_v55  ;;  %v1000_v55 = vadd.f32 %v999_v2, %v910_v1  ;;  %v920_v2 = vpop.f32.mrf.mxu0 }
 0x149   : > { %v1078_v60 = vpop.f32.mrf.mxu2 }
 0x14a   : > { %v1167_v62 = vpop.f32.mrf.mxu3  ;;  %v1079_v8 = vadd.f32 %v1078_v60, %v990_v63  ;;  %v2257_v60 = vld [vmem:[%s2541_s9 + $0x174] sm:$0xf0]  ;;  %v1954_v63 = vld [vmem:[%s2541_s9 + $0x178] sm:$0xf0] }
 0x14c   : > { %v1168_v17 = vadd.f32 %v1167_v62, %v1079_v8  ;;  %v2255_v62 = vld [vmem:[%s2541_s9 + $0x16c] sm:$0xf]  ;;  %v1953_v8 = vor.u32 %v2257_v60, %v1952_v59 }
 0x14f   : > { %v922_v29 = vpop.f32.mrf.mxu0 }
 0x151   : > { %v1080_v11 = vpop.f32.mrf.mxu2 }
 0x152   : > { %v1169_v12 = vpop.f32.mrf.mxu3  ;;  %v1081_v13 = vadd.f32 %v1080_v11, %v992_v7  ;;  %v1957_v11 = vor.u32 %v2255_v62, %v1954_v63 }
 0x154   : > { %v1170_v19 = vadd.f32 %v1169_v12, %v1081_v13 }
 0x156   : > { %v1247_v20 = vpack.c.bf16 %v1170_v19, %v1168_v17  ;;  %1122 = vmatmul.bf16.gmra.mxu2 %v1921_v14  ;;  %v1009_v14 = vpop.f32.mrf.mxu1 }
 0x157   : > { %1211 = vmatmul.bf16.gmra.mxu3 %v1925_v16  ;;  %v2312_v16 = vld [vmem:[%s2990_s4 + $0x20] sm:$0xff] }
 0x158   : > { %2158 = vmatmul.msk.bf16.vlgmr.msrb.gmra.mxu0 %vm1283_vm0, %v1247_v20  ;;  %1536 = vmatpush.bf16.msrb.mxu1 %v2312_v16  ;;  %v1005_v20 = vadd.f32 %v1004_v47, %v915_v46  ;;  %v2000_v16 = vld [vmem:[%s2541_s9 + $0x1c8] sm:$0xf] }
 0x159   : > { %v1083_v24 = vpop.f32.mrf.mxu2 }
 0x15a   : > { %v1172_v26 = vpop.f32.mrf.mxu3  ;;  %v1084_v35 = vadd.f32 %v1083_v24, %v995_v27  ;;  %v1970_v24 = vld [vmem:[%s2541_s9 + $0x198] sm:$0xf0] }
 0x15c   : > { %v1173_v49 = vadd.f32 %v1172_v26, %v1084_v35  ;;  %v1007_v26 = vadd.f32 %v1006_v58, %v917_v57  ;;  %v1969_v35 = vor.u32 %v2261_v22, %v1968_v21 }
 0x15e   : > { %v1011_v30 = vpop.f32.mrf.mxu1 }
 0x15f   : > { %v1012_v57 = vadd.f32 %v1011_v30, %v922_v29 }
 0x161   : > { %v1085_v37 = vpop.f32.mrf.mxu2 }
 0x162   : > { %v1174_v38 = vpop.f32.mrf.mxu3  ;;  %v1086_v39 = vadd.f32 %v1085_v37, %v997_v33  ;;  %v1973_v37 = vor.u32 %v2259_v23, %v1970_v24 }
 0x164   : > { %v1175_v50 = vadd.f32 %v1174_v38, %v1086_v39 }
 0x166   : > { %v1248_v42 = vpack.c.bf16 %v1175_v50, %v1173_v49  ;;  %1127 = vmatmul.bf16.gmra.mxu2 %v1937_v40  ;;  %v925_v49 = vpop.f32.mrf.mxu0  ;;  %v1014_v50 = vpop.f32.mrf.mxu1 }
 0x167   : > { %1216 = vmatmul.bf16.gmra.mxu3 %v1941_v45  ;;  %v2311_v45 = vld [vmem:[%s2990_s4 + $0x18] sm:$0xff] }
 0x168   : > { %2159 = vmatmul.msk.bf16.gmra.mxu0 %vm1283_vm0, %v1248_v42  ;;  %1537 = vmatpush.bf16.msrb.mxu1 %v2311_v45  ;;  %v1010_v42 = vadd.f32 %v1009_v14, %v920_v2  ;;  %v2016_v45 = vld [vmem:[%s2541_s9 + $0x1e8] sm:$0xf] }
 0x169   : > { %v1088_v51 = vpop.f32.mrf.mxu2 }
 0x16a   : > { %v1177_v54 = vpop.f32.mrf.mxu3  ;;  %v1089_v3 = vadd.f32 %v1088_v51, %v1000_v55  ;;  %v2265_v51 = vld [vmem:[%s2541_s9 + $0x1b4] sm:$0xf0]  ;;  %v1986_v55 = vld [vmem:[%s2541_s9 + $0x1b8] sm:$0xf0] }
 0x16b   : > { %v1985_v63 = vor.u32 %v2265_v51, %v1984_v44 }
 0x16c   : > { %v1178_v12 = vadd.f32 %v1177_v54, %v1089_v3  ;;  %v2263_v54 = vld [vmem:[%s2541_s9 + $0x1ac] sm:$0xf] }
 0x171   : > { %v1090_v5 = vpop.f32.mrf.mxu2 }
 0x172   : > { %v1179_v6 = vpop.f32.mrf.mxu3  ;;  %v1091_v7 = vadd.f32 %v1090_v5, %v1002_v0  ;;  %v1989_v0 = vor.u32 %v2263_v54, %v1986_v55 }
 0x174   : > { %v1180_v13 = vadd.f32 %v1179_v6, %v1091_v7  ;;  %v927_v6 = vpop.f32.mrf.mxu0  ;;  %v1016_v7 = vpop.f32.mrf.mxu1 }
 0x175   : > { %v1017_v21 = vadd.f32 %v1016_v7, %v927_v6 }
 0x176   : > { %v1249_v1 = vpack.c.bf16 %v1180_v13, %v1178_v12  ;;  %1132 = vmatmul.bf16.gmra.mxu2 %v1953_v8 }
 0x177   : > { %1221 = vmatmul.bf16.gmra.mxu3 %v1957_v11  ;;  %v2310_v11 = vld [vmem:[%s2990_s4 + $0x10] sm:$0xff] }
 0x178   : > { %2160 = vmatmul.msk.bf16.gmra.mxu0 %vm1283_vm0, %v1249_v1  ;;  %1538 = vmatpush.bf16.msrb.mxu1 %v2310_v11  ;;  %v1015_v1 = vadd.f32 %v1014_v50, %v925_v49  ;;  %v2018_v49 = vld [vmem:[%s2541_s9 + $0x1f8] sm:$0xf0] }
 0x179   : > { %v1093_v17 = vpop.f32.mrf.mxu2 }
 0x17a   : > { %v1182_v19 = vpop.f32.mrf.mxu3  ;;  %v1094_v27 = vadd.f32 %v1093_v17, %v1005_v20  ;;  %v2269_v17 = vld [vmem:[%s2541_s9 + $0x1d4] sm:$0xf0]  ;;  %v2002_v20 = vld [vmem:[%s2541_s9 + $0x1d8] sm:$0xf0] }
 0x17c   : > { %v1183_v38 = vadd.f32 %v1182_v19, %v1094_v27  ;;  %v930_v2 = vpop.f32.mrf.mxu0  ;;  %v1019_v14 = vpop.f32.mrf.mxu1  ;;  %v2267_v19 = vld [vmem:[%s2541_s9 + $0x1cc] sm:$0xf]  ;;  %v2001_v27 = vor.u32 %v2269_v17, %v2000_v16 }
 0x17d   : > { %v2005_v29 = vor.u32 %v2267_v19, %v2002_v20 }
 0x181   : > { %v1095_v31 = vpop.f32.mrf.mxu2 }
 0x182   : > { %v1184_v32 = vpop.f32.mrf.mxu3  ;;  %v1096_v33 = vadd.f32 %v1095_v31, %v1007_v26 }
 0x184   : > { %v1185_v39 = vadd.f32 %v1184_v32, %v1096_v33  ;;  %v2309_v33 = vld [vmem:[%s2990_s4 + $0x8] sm:$0xff] }
 0x185   : > { %1539 = vmatpush.bf16.msrb.mxu1 %v2309_v33 }
 0x186   : > { %v1250_v40 = vpack.c.bf16 %v1185_v39, %v1183_v38  ;;  %1137 = vmatmul.bf16.gmra.mxu2 %v1969_v35  ;;  %v932_v35 = vpop.f32.mrf.mxu0 }
 0x187   : > { %1226 = vmatmul.bf16.gmra.mxu3 %v1973_v37  ;;  %v1021_v37 = vpop.f32.mrf.mxu1 }
 0x188   : > { %2161 = vmatmul.msk.bf16.gmra.mxu0 %vm1283_vm0, %v1250_v40  ;;  %v1020_v40 = vadd.f32 %v1019_v14, %v930_v2  ;;  %v1022_v50 = vadd.f32 %v1021_v37, %v932_v35 }
 0x189   : > { %v1098_v46 = vpop.f32.mrf.mxu2 }
 0x18a   : > { %v1187_v47 = vpop.f32.mrf.mxu3  ;;  %v1099_v58 = vadd.f32 %v1098_v46, %v1010_v42  ;;  %v2273_v46 = vld [vmem:[%s2541_s9 + $0x1f4] sm:$0xf0] }
 0x18b   : > { %v2017_v55 = vor.u32 %v2273_v46, %v2016_v45 }
 0x18c   : > { %v1188_v3 = vadd.f32 %v1187_v47, %v1099_v58  ;;  %v2271_v47 = vld [vmem:[%s2541_s9 + $0x1ec] sm:$0xf] }
 0x18e   : > { %v935_v58 = vpop.f32.mrf.mxu0 }
 0x191   : > { %v1100_v59 = vpop.f32.mrf.mxu2 }
 0x192   : > { %v1189_v60 = vpop.f32.mrf.mxu3  ;;  %v1101_v62 = vadd.f32 %v1100_v59, %v1012_v57  ;;  %v2021_v57 = vor.u32 %v2271_v47, %v2018_v49  ;;  %v1024_v59 = vpop.f32.mrf.mxu1 }
 0x193   : > { %v1025_v6 = vadd.f32 %v1024_v59, %v935_v58 }
 0x194   : > { %v1190_v5 = vadd.f32 %v1189_v60, %v1101_v62 }
 0x196   : > { %v1251_v8 = vpack.c.bf16 %v1190_v5, %v1188_v3  ;;  %1142 = vmatmul.bf16.gmra.mxu2 %v1985_v63  ;;  %v937_v7 = vpop.f32.mrf.mxu0 }
 0x197   : > { %1231 = vmatmul.bf16.gmra.mxu3 %v1989_v0  ;;  %v2308_v0 = vld [vmem:[%s2990_s4] sm:$0xff] }
 0x198   : > { %2162 = vmatmul.msk.bf16.gmra.mxu0 %vm1283_vm0, %v1251_v8  ;;  %1540 = vmatpush.bf16.msrb.mxu1 %v2308_v0 }
 0x199   : > { %v1103_v12 = vpop.f32.mrf.mxu2 }
 0x19a   : > { %v1192_v13 = vpop.f32.mrf.mxu3  ;;  %v1104_v22 = vadd.f32 %v1103_v12, %v1015_v1  ;;  %v1026_v8 = vpop.f32.mrf.mxu1 }
 0x19b   : > { %v1027_v11 = vadd.f32 %v1026_v8, %v937_v7 }
 0x19c   : > { %v1193_v30 = vadd.f32 %v1192_v13, %v1104_v22 }
 0x1a1   : > { %v1105_v23 = vpop.f32.mrf.mxu2 }
 0x1a2   : > { %v1194_v24 = vpop.f32.mrf.mxu3  ;;  %v1106_v26 = vadd.f32 %v1105_v23, %v1017_v21 }
 0x1a4   : > { %v1195_v31 = vadd.f32 %v1194_v24, %v1106_v26 }
 0x1a6   : > { %v1252_v32 = vpack.c.bf16 %v1195_v31, %v1193_v30  ;;  %1147 = vmatmul.bf16.gmra.mxu2 %v2001_v27  ;;  %v2846_v31 = vld [vmem:[%s2989_s3] ss:$0 sm:$0xff] }
 0x1a7   : > { %1236 = vmatmul.bf16.gmra.mxu3 %v2005_v29 }
 0x1a8   : > { %2163 = vmatmul.msk.bf16.gmra.mxu0 %vm1283_vm0, %v1252_v32 }
 0x1a9   : > { %v1108_v38 = vpop.f32.mrf.mxu2 }
 0x1aa   : > { %v1197_v39 = vpop.f32.mrf.mxu3  ;;  %v1109_v42 = vadd.f32 %v1108_v38, %v1020_v40 }
 0x1ac   : > { %v1198_v60 = vadd.f32 %v1197_v39, %v1109_v42 }
 0x1b1   : > { %v1110_v44 = vpop.f32.mrf.mxu2 }
 0x1b2   : > { %v1199_v51 = vpop.f32.mrf.mxu3  ;;  %v1111_v54 = vadd.f32 %v1110_v44, %v1022_v50 }
 0x1b4   : > { %v1200_v62 = vadd.f32 %v1199_v51, %v1111_v54 }
 0x1b6   : > { %v1253_v63 = vpack.c.bf16 %v1200_v62, %v1198_v60  ;;  %1152 = vmatmul.bf16.gmra.mxu2 %v2017_v55 }
 0x1b7   : > { %1241 = vmatmul.bf16.gmra.mxu3 %v2021_v57 }
 0x1b8   : > { %2164 = vmatmul.msk.bf16.gmra.mxu0 %vm1283_vm0, %v1253_v63 }
 0x1b9   : > { %v1113_v3 = vpop.f32.mrf.mxu2 }
 0x1ba   : > { %v1202_v5 = vpop.f32.mrf.mxu3  ;;  %v1114_v12 = vadd.f32 %v1113_v3, %v1025_v6 }
 0x1bc   : > { %v1203_v14 = vadd.f32 %v1202_v5, %v1114_v12 }
 0x1c1   : > { %v1115_v13 = vpop.f32.mrf.mxu2 }
 0x1c2   : > { %v1204_v1 = vpop.f32.mrf.mxu3  ;;  %v1116_v2 = vadd.f32 %v1115_v13, %v1027_v11 }
 0x1c4   : > { %v1205_v16 = vadd.f32 %v1204_v1, %v1116_v2 }
 0x1c6   : > { %v1254_v17 = vpack.c.bf16 %v1205_v16, %v1203_v14 }
 0x1c8   : > { %2165 = vmatmul.msk.bf16.gmra.mxu0 %vm1283_vm0, %v1254_v17 }
 0x1c9   : > { %v1118_v19 = vpop.f32.mrf.mxu2 }
 0x1ca   : > { %v1207_v20 = vpop.f32.mrf.mxu3  ;;  %v1119_v21 = vadd.f32 %v1118_v19, %v2694_v43 }
 0x1cc   : > { %v1208_v26 = vadd.f32 %v1207_v20, %v1119_v21 }
 0x1d1   : > { %v1120_v22 = vpop.f32.mrf.mxu2 }
 0x1d2   : > { %v1209_v23 = vpop.f32.mrf.mxu3  ;;  %v1121_v24 = vadd.f32 %v1120_v22, %v2704_v56 }
 0x1d4   : > { %v1210_v27 = vadd.f32 %v1209_v23, %v1121_v24 }
 0x1d5   : > { %v1341_v29 = vpop.f32.mrf.mxu0 }
 0x1d6   : > { %v1255_v30 = vpack.c.bf16 %v1210_v27, %v1208_v26  ;;  %v1342_v35 = vadd.f32 %v2846_v31, %v1341_v29 }
 0x1d8   : > { %2166 = vmatmul.msk.bf16.gmra.mxu0 %vm1283_vm0, %v1255_v30  ;;  %v1421_v38 = vmax.f32 %v1342_v35, 0.0 }
 0x1d9   : > { %v1123_v32 = vpop.f32.mrf.mxu2 }
 0x1da   : > { %v1212_v33 = vpop.f32.mrf.mxu3  ;;  %v1124_v56 = vadd.f32 %v1123_v32, %v2706_v61 }
 0x1dc   : > { %v1213_v49 = vadd.f32 %v1212_v33, %v1124_v56 }
 0x1dd   : > { %v1343_v43 = vpop.f32.mrf.mxu0 }
 0x1de   : > { %v1344_v37 = vadd.f32 %v2846_v31, %v1343_v43 }
 0x1e0   : > { %v1422_v39 = vmax.f32 %v1344_v37, 0.0 }
 0x1e1   : > { %v1125_v40 = vpop.f32.mrf.mxu2 }
 0x1e2   : > { %v1214_v45 = vpop.f32.mrf.mxu3  ;;  %v1126_v46 = vadd.f32 %v1125_v40, %v2716_v10  ;;  %v1453_v47 = vpack.c.bf16 %v1422_v39, %v1421_v38 }
 0x1e4   : > { %v1215_v50 = vadd.f32 %v1214_v45, %v1126_v46  ;;  %1541 = vmatmul.bf16.vlgmr.msrb.gmra.mxu1 %v1453_v47 }
 0x1e5   : > { %v1346_v42 = vpop.f32.mrf.mxu0 }
 0x1e6   : > { %v1256_v44 = vpack.c.bf16 %v1215_v50, %v1213_v49  ;;  %v1347_v55 = vadd.f32 %v2846_v31, %v1346_v42 }
 0x1e8   : > { %2167 = vmatmul.msk.bf16.gmra.mxu0 %vm1283_vm0, %v1256_v44  ;;  %v1423_v58 = vmax.f32 %v1347_v55, 0.0 }
 0x1e9   : > { %v1128_v51 = vpop.f32.mrf.mxu2 }
 0x1ea   : > { %v1217_v54 = vpop.f32.mrf.mxu3  ;;  %v1129_v59 = vadd.f32 %v1128_v51, %v2718_v15 }
 0x1ec   : > { %v1218_v3 = vadd.f32 %v1217_v54, %v1129_v59 }
 0x1ed   : > { %v1348_v57 = vpop.f32.mrf.mxu0 }
 0x1ee   : > { %v1349_v61 = vadd.f32 %v2846_v31, %v1348_v57 }
 0x1f0   : > { %v1424_v60 = vmax.f32 %v1349_v61, 0.0 }
 0x1f1   : > { %v1130_v10 = vpop.f32.mrf.mxu2 }
 0x1f2   : > { %v1219_v62 = vpop.f32.mrf.mxu3  ;;  %v1131_v63 = vadd.f32 %v1130_v10, %v2728_v28  ;;  %v1454_v0 = vpack.c.bf16 %v1424_v60, %v1423_v58 }
 0x1f4   : > { %v1220_v5 = vadd.f32 %v1219_v62, %v1131_v63  ;;  %1546 = vmatmul.bf16.gmra.mxu1 %v1454_v0 }
 0x1f5   : > { %v1351_v6 = vpop.f32.mrf.mxu0 }
 0x1f6   : > { %v1257_v7 = vpack.c.bf16 %v1220_v5, %v1218_v3  ;;  %v1352_v12 = vadd.f32 %v2846_v31, %v1351_v6 }
 0x1f8   : > { %2168 = vmatmul.msk.bf16.gmra.mxu0 %vm1283_vm0, %v1257_v7  ;;  %v1425_v1 = vmax.f32 %v1352_v12, 0.0 }
 0x1f9   : > { %v1133_v8 = vpop.f32.mrf.mxu2 }
 0x1fa   : > { %v1222_v11 = vpop.f32.mrf.mxu3  ;;  %v1134_v2 = vadd.f32 %v1133_v8, %v2733_v34 }
 0x1fc   : > { %v1223_v20 = vadd.f32 %v1222_v11, %v1134_v2 }
 0x1fd   : > { %v1353_v13 = vpop.f32.mrf.mxu0 }
 0x1fe   : > { %v1354_v15 = vadd.f32 %v2846_v31, %v1353_v13 }
 0x200   : > { %v1426_v14 = vmax.f32 %v1354_v15, 0.0 }
 0x201   : > { %v1135_v28 = vpop.f32.mrf.mxu2 }
 0x202   : > { %v1224_v16 = vpop.f32.mrf.mxu3  ;;  %v1136_v17 = vadd.f32 %v1135_v28, %v2743_v48  ;;  %v1455_v19 = vpack.c.bf16 %v1426_v14, %v1425_v1 }
 0x204   : > { %v1225_v21 = vadd.f32 %v1224_v16, %v1136_v17  ;;  %1551 = vmatmul.bf16.gmra.mxu1 %v1455_v19 }
 0x205   : > { %v1356_v22 = vpop.f32.mrf.mxu0 }
 0x206   : > { %v1258_v23 = vpack.c.bf16 %v1225_v21, %v1223_v20  ;;  %v1357_v27 = vadd.f32 %v2846_v31, %v1356_v22 }
 0x208   : > { %2169 = vmatmul.msk.bf16.gmra.mxu0 %vm1283_vm0, %v1258_v23  ;;  %v1427_v30 = vmax.f32 %v1357_v27, 0.0 }
 0x209   : > { %v1138_v24 = vpop.f32.mrf.mxu2 }
 0x20a   : > { %v1227_v26 = vpop.f32.mrf.mxu3  ;;  %v1139_v32 = vadd.f32 %v1138_v24, %v2745_v53 }
 0x20c   : > { %v1228_v38 = vadd.f32 %v1227_v26, %v1139_v32 }
 0x20d   : > { %v1358_v29 = vpop.f32.mrf.mxu0 }
 0x20e   : > { %v1359_v34 = vadd.f32 %v2846_v31, %v1358_v29 }
 0x210   : > { %v1428_v33 = vmax.f32 %v1359_v34, 0.0 }
 0x211   : > { %v1140_v48 = vpop.f32.mrf.mxu2 }
 0x212   : > { %v1229_v35 = vpop.f32.mrf.mxu3  ;;  %v1141_v43 = vadd.f32 %v1140_v48, %v2755_v4  ;;  %v1456_v37 = vpack.c.bf16 %v1428_v33, %v1427_v30 }
 0x214   : > { %v1230_v56 = vadd.f32 %v1229_v35, %v1141_v43  ;;  %1556 = vmatmul.bf16.gmra.mxu1 %v1456_v37 }
 0x215   : > { %v1361_v39 = vpop.f32.mrf.mxu0 }
 0x216   : > { %v1259_v40 = vpack.c.bf16 %v1230_v56, %v1228_v38  ;;  %v1362_v47 = vadd.f32 %v2846_v31, %v1361_v39 }
 0x218   : > { %2170 = vmatmul.msk.bf16.gmra.mxu0 %vm1283_vm0, %v1259_v40  ;;  %v1429_v50 = vmax.f32 %v1362_v47, 0.0 }
 0x219   : > { %v1143_v45 = vpop.f32.mrf.mxu2 }
 0x21a   : > { %v1232_v46 = vpop.f32.mrf.mxu3  ;;  %v1144_v42 = vadd.f32 %v1143_v45, %v2757_v9 }
 0x21c   : > { %v1233_v57 = vadd.f32 %v1232_v46, %v1144_v42 }
 0x21d   : > { %v1363_v49 = vpop.f32.mrf.mxu0 }
 0x21e   : > { %v1364_v53 = vadd.f32 %v2846_v31, %v1363_v49 }
 0x220   : > { %v1430_v44 = vmax.f32 %v1364_v53, 0.0 }
 0x221   : > { %v1145_v4 = vpop.f32.mrf.mxu2 }
 0x222   : > { %v1234_v51 = vpop.f32.mrf.mxu3  ;;  %v1457_v54 = vpack.c.bf16 %v1430_v44, %v1429_v50  ;;  %v1146_v55 = vadd.f32 %v1145_v4, %v2763_v18 }
 0x224   : > { %v1235_v61 = vadd.f32 %v1234_v51, %v1146_v55  ;;  %1561 = vmatmul.bf16.gmra.mxu1 %v1457_v54 }
 0x225   : > { %v1366_v58 = vpop.f32.mrf.mxu0 }
 0x226   : > { %v1260_v59 = vpack.c.bf16 %v1235_v61, %v1233_v57  ;;  %v1367_v62 = vadd.f32 %v2846_v31, %v1366_v58 }
 0x228   : > { %2171 = vmatmul.msk.bf16.gmra.mxu0 %vm1283_vm0, %v1260_v59  ;;  %v1431_v0 = vmax.f32 %v1367_v62, 0.0 }
 0x229   : > { %v1148_v60 = vpop.f32.mrf.mxu2 }
 0x22a   : > { %v1237_v10 = vpop.f32.mrf.mxu3  ;;  %v1149_v3 = vadd.f32 %v1148_v60, %v2765_v25 }
 0x22c   : > { %v1238_v11 = vadd.f32 %v1237_v10, %v1149_v3 }
 0x22d   : > { %v1368_v63 = vpop.f32.mrf.mxu0 }
 0x22e   : > { %v1369_v9 = vadd.f32 %v2846_v31, %v1368_v63 }
 0x230   : > { %v1432_v5 = vmax.f32 %v1369_v9, 0.0 }
 0x231   : > { %v1150_v6 = vpop.f32.mrf.mxu2 }
 0x232   : > { %v1239_v18 = vpop.f32.mrf.mxu3  ;;  %v1458_v7 = vpack.c.bf16 %v1432_v5, %v1431_v0  ;;  %v1151_v8 = vadd.f32 %v1150_v6, %v2771_v36 }
 0x234   : > { %v1240_v12 = vadd.f32 %v1239_v18, %v1151_v8  ;;  %1566 = vmatmul.bf16.gmra.mxu1 %v1458_v7 }
 0x235   : > { %v1371_v13 = vpop.f32.mrf.mxu0 }
 0x236   : > { %v1261_v15 = vpack.c.bf16 %v1240_v12, %v1238_v11  ;;  %v1372_v14 = vadd.f32 %v2846_v31, %v1371_v13 }
 0x238   : > { %2172 = vmatmul.msk.bf16.gmra.mxu0 %vm1283_vm0, %v1261_v15  ;;  %v1433_v16 = vmax.f32 %v1372_v14, 0.0 }
 0x239   : > { %v1153_v1 = vpop.f32.mrf.mxu2 }
 0x23a   : > { %v1242_v2 = vpop.f32.mrf.mxu3  ;;  %v1154_v17 = vadd.f32 %v1153_v1, %v2773_v41 }
 0x23c   : > { %v1243_v23 = vadd.f32 %v1242_v2, %v1154_v17 }
 0x23d   : > { %v1373_v28 = vpop.f32.mrf.mxu0 }
 0x23e   : > { %v1374_v25 = vadd.f32 %v2846_v31, %v1373_v28 }
 0x240   : > { %v1434_v19 = vmax.f32 %v1374_v25, 0.0 }
 0x241   : > { %v1155_v20 = vpop.f32.mrf.mxu2 }
 0x242   : > { %v1459_v36 = vpack.c.bf16 %v1434_v19, %v1433_v16  ;;  %v1156_v21 = vadd.f32 %v1155_v20, %v2779_v52  ;;  %v1244_v22 = vpop.f32.mrf.mxu3 }
 0x244   : > { %v1245_v24 = vadd.f32 %v1244_v22, %v1156_v21  ;;  %1571 = vmatmul.bf16.gmra.mxu1 %v1459_v36 }
 0x245   : > { %v1376_v26 = vpop.f32.mrf.mxu0 }
 0x246   : > { %v1262_v27 = vpack.c.bf16 %v1245_v24, %v1243_v23  ;;  %v1377_v29 = vadd.f32 %v2846_v31, %v1376_v26 }
 0x248   : > { %2173 = vmatmul.msk.bf16.gmra.mxu0 %vm1283_vm0, %v1262_v27  ;;  %v1435_v41 = vmax.f32 %v1377_v29, 0.0 }
 0x24d   : > { %v1378_v34 = vpop.f32.mrf.mxu0 }
 0x24e   : > { %v1379_v30 = vadd.f32 %v2846_v31, %v1378_v34 }
 0x250   : > { %v1436_v32 = vmax.f32 %v1379_v30, 0.0 }
 0x252   : > { %v1460_v33 = vpack.c.bf16 %v1436_v32, %v1435_v41 }
 0x254   : > { %1576 = vmatmul.bf16.gmra.mxu1 %v1460_v33 }
 0x255   : > { %v1381_v52 = vpop.f32.mrf.mxu0 }
 0x256   : > { %v1382_v48 = vadd.f32 %v2846_v31, %v1381_v52 }
 0x258   : > { %v1437_v37 = vmax.f32 %v1382_v48, 0.0 }
 0x25d   : > { %v1383_v35 = vpop.f32.mrf.mxu0 }
 0x25e   : > { %v1384_v43 = vadd.f32 %v2846_v31, %v1383_v35 }
 0x260   : > { %v1438_v38 = vmax.f32 %v1384_v43, 0.0 }
 0x261   : > { %v1542_v56 = vpop.f32.mrf.mxu1 }
 0x262   : > { %v1461_v39 = vpack.c.bf16 %v1438_v38, %v1437_v37  ;;  %v1622_v40 = vpack.c.bf16 %v1542_v56, %v1542_v56 }
 0x264   : > { %1655 = vst.msk [vmem:[%s2893_s8] sm:$0xf] %vm1654_vm1, %v1622_v40  ;;  %1581 = vmatmul.bf16.gmra.mxu1 %v1461_v39 }
 0x265   : > { %v1386_v45 = vpop.f32.mrf.mxu0 }
 0x266   : > { %v1387_v49 = vadd.f32 %v2846_v31, %v1386_v45 }
 0x268   : > { %v1439_v42 = vmax.f32 %v1387_v49, 0.0 }
 0x269   : > { %v1544_v46 = vpop.f32.mrf.mxu1 }
 0x26a   : > { %v1623_v47 = vpack.c.bf16 %v1544_v46, %v1544_v46 }
 0x26c   : > { %1656 = vst.msk [vmem:[%s2893_s8 + $0x4] sm:$0xf] %vm1654_vm1, %v1623_v47 }
 0x26d   : > { %v1388_v53 = vpop.f32.mrf.mxu0 }
 0x26e   : > { %v1389_v50 = vadd.f32 %v2846_v31, %v1388_v53 }
 0x270   : > { %v1440_v44 = vmax.f32 %v1389_v50, 0.0 }
 0x271   : > { %v1547_v4 = vpop.f32.mrf.mxu1 }
 0x272   : > { %v1462_v51 = vpack.c.bf16 %v1440_v44, %v1439_v42  ;;  %v1624_v54 = vpack.c.bf16 %v1547_v4, %v1547_v4 }
 0x274   : > { %1657 = vst.msk [vmem:[%s2893_s8 + $0x8] sm:$0xf] %vm1654_vm1, %v1624_v54  ;;  %1586 = vmatmul.bf16.gmra.mxu1 %v1462_v51 }
 0x275   : > { %v1391_v55 = vpop.f32.mrf.mxu0 }
 0x276   : > { %v1392_v58 = vadd.f32 %v2846_v31, %v1391_v55 }
 0x278   : > { %v1441_v10 = vmax.f32 %v1392_v58, 0.0 }
 0x279   : > { %v1549_v57 = vpop.f32.mrf.mxu1 }
 0x27a   : > { %v1625_v61 = vpack.c.bf16 %v1549_v57, %v1549_v57 }
 0x27c   : > { %1658 = vst.msk [vmem:[%s2893_s8 + $0xc] sm:$0xf] %vm1654_vm1, %v1625_v61 }
 0x27d   : > { %v1393_v59 = vpop.f32.mrf.mxu0 }
 0x27e   : > { %v1394_v60 = vadd.f32 %v2846_v31, %v1393_v59 }
 0x280   : > { %v1442_v62 = vmax.f32 %v1394_v60, 0.0 }
 0x281   : > { %v1552_v63 = vpop.f32.mrf.mxu1 }
 0x282   : > { %v1463_v9 = vpack.c.bf16 %v1442_v62, %v1441_v10  ;;  %v1626_v0 = vpack.c.bf16 %v1552_v63, %v1552_v63 }
 0x284   : > { %1659 = vst.msk [vmem:[%s2893_s8 + $0x10] sm:$0xf] %vm1654_vm1, %v1626_v0  ;;  %1591 = vmatmul.bf16.gmra.mxu1 %v1463_v9 }
 0x285   : > { %v1396_v3 = vpop.f32.mrf.mxu0 }
 0x286   : > { %v1397_v18 = vadd.f32 %v2846_v31, %v1396_v3 }
 0x288   : > { %v1443_v11 = vmax.f32 %v1397_v18, 0.0 }
 0x289   : > { %v1554_v5 = vpop.f32.mrf.mxu1 }
 0x28a   : > { %v1627_v6 = vpack.c.bf16 %v1554_v5, %v1554_v5 }
 0x28c   : > { %1660 = vst.msk [vmem:[%s2893_s8 + $0x14] sm:$0xf] %vm1654_vm1, %v1627_v6 }
 0x28d   : > { %v1398_v7 = vpop.f32.mrf.mxu0 }
 0x28e   : > { %v1399_v8 = vadd.f32 %v2846_v31, %v1398_v7 }
 0x290   : > { %v1444_v12 = vmax.f32 %v1399_v8, 0.0 }
 0x291   : > { %v1557_v13 = vpop.f32.mrf.mxu1 }
 0x292   : > { %v1464_v15 = vpack.c.bf16 %v1444_v12, %v1443_v11  ;;  %v1628_v1 = vpack.c.bf16 %v1557_v13, %v1557_v13 }
 0x294   : > { %1661 = vst.msk [vmem:[%s2893_s8 + $0x18] sm:$0xf] %vm1654_vm1, %v1628_v1  ;;  %1596 = vmatmul.bf16.gmra.mxu1 %v1464_v15 }
 0x295   : > { %v1401_v2 = vpop.f32.mrf.mxu0 }
 0x296   : > { %v1402_v25 = vadd.f32 %v2846_v31, %v1401_v2 }
 0x298   : > { %v1445_v19 = vmax.f32 %v1402_v25, 0.0 }
 0x299   : > { %v1559_v14 = vpop.f32.mrf.mxu1 }
 0x29a   : > { %v1629_v28 = vpack.c.bf16 %v1559_v14, %v1559_v14 }
 0x29c   : > { %1662 = vst.msk [vmem:[%s2893_s8 + $0x1c] sm:$0xf] %vm1654_vm1, %v1629_v28 }
 0x29d   : > { %v1403_v16 = vpop.f32.mrf.mxu0 }
 0x29e   : > { %v1404_v17 = vadd.f32 %v2846_v31, %v1403_v16 }
 0x2a0   : > { %v1446_v20 = vmax.f32 %v1404_v17, 0.0 }
 0x2a1   : > { %v1562_v36 = vpop.f32.mrf.mxu1 }
 0x2a2   : > { %v1465_v21 = vpack.c.bf16 %v1446_v20, %v1445_v19  ;;  %v1630_v22 = vpack.c.bf16 %v1562_v36, %v1562_v36 }
 0x2a4   : > { %1663 = vst.msk [vmem:[%s2893_s8 + $0x20] sm:$0xf] %vm1654_vm1, %v1630_v22  ;;  %1601 = vmatmul.bf16.gmra.mxu1 %v1465_v21 }
 0x2a5   : > { %v1406_v23 = vpop.f32.mrf.mxu0 }
 0x2a6   : > { %v1407_v27 = vadd.f32 %v2846_v31, %v1406_v23 }
 0x2a8   : > { %v1447_v30 = vmax.f32 %v1407_v27, 0.0 }
 0x2a9   : > { %v1564_v24 = vpop.f32.mrf.mxu1 }
 0x2aa   : > { %v1631_v26 = vpack.c.bf16 %v1564_v24, %v1564_v24 }
 0x2ac   : > { %1664 = vst.msk [vmem:[%s2893_s8 + $0x24] sm:$0xf] %vm1654_vm1, %v1631_v26 }
 0x2ad   : > { %v1408_v29 = vpop.f32.mrf.mxu0 }
 0x2ae   : > { %v1409_v34 = vadd.f32 %v2846_v31, %v1408_v29 }
 0x2b0   : > { %v1448_v41 = vmax.f32 %v1409_v34, 0.0 }
 0x2b1   : > { %v1567_v32 = vpop.f32.mrf.mxu1 }
 0x2b2   : > { %v1466_v33 = vpack.c.bf16 %v1448_v41, %v1447_v30  ;;  %v1632_v52 = vpack.c.bf16 %v1567_v32, %v1567_v32 }
 0x2b4   : > { %1665 = vst.msk [vmem:[%s2893_s8 + $0x28] sm:$0xf] %vm1654_vm1, %v1632_v52  ;;  %1606 = vmatmul.bf16.gmra.mxu1 %v1466_v33 }
 0x2b5   : > { %v1411_v48 = vpop.f32.mrf.mxu0 }
 0x2b6   : > { %v1412_v37 = vadd.f32 %v2846_v31, %v1411_v48 }
 0x2b8   : > { %v1449_v39 = vmax.f32 %v1412_v37, 0.0 }
 0x2b9   : > { %v1569_v35 = vpop.f32.mrf.mxu1 }
 0x2ba   : > { %v1633_v43 = vpack.c.bf16 %v1569_v35, %v1569_v35 }
 0x2bc   : > { %1666 = vst.msk [vmem:[%s2893_s8 + $0x2c] sm:$0xf] %vm1654_vm1, %v1633_v43 }
 0x2bd   : > { %v1413_v38 = vpop.f32.mrf.mxu0 }
 0x2be   : > { %v1414_v56 = vadd.f32 %v2846_v31, %v1413_v38 }
 0x2c0   : > { %v1450_v40 = vmax.f32 %v1414_v56, 0.0 }
 0x2c1   : > { %v1572_v45 = vpop.f32.mrf.mxu1 }
 0x2c2   : > { %v1467_v46 = vpack.c.bf16 %v1450_v40, %v1449_v39  ;;  %v1634_v47 = vpack.c.bf16 %v1572_v45, %v1572_v45 }
 0x2c4   : > { %1667 = vst.msk [vmem:[%s2893_s8 + $0x30] sm:$0xf] %vm1654_vm1, %v1634_v47  ;;  %1611 = vmatmul.bf16.gmra.mxu1 %v1467_v46 }
 0x2c5   : > { %v1416_v49 = vpop.f32.mrf.mxu0 }
 0x2c6   : > { %v1417_v42 = vadd.f32 %v2846_v31, %v1416_v49 }
 0x2c8   : > { %v1451_v51 = vmax.f32 %v1417_v42, 0.0 }
 0x2c9   : > { %v1574_v53 = vpop.f32.mrf.mxu1 }
 0x2ca   : > { %v1635_v50 = vpack.c.bf16 %v1574_v53, %v1574_v53 }
 0x2cc   : > { %1668 = vst.msk [vmem:[%s2893_s8 + $0x34] sm:$0xf] %vm1654_vm1, %v1635_v50 }
 0x2cd   : > { %v1418_v44 = vpop.f32.mrf.mxu0 }
 0x2ce   : > { %v1419_v4 = vadd.f32 %v2846_v31, %v1418_v44 }
 0x2d0   : > { %v1452_v54 = vmax.f32 %v1419_v4, 0.0 }
 0x2d1   : > { %v1577_v55 = vpop.f32.mrf.mxu1 }
 0x2d2   : > { %v1468_v57 = vpack.c.bf16 %v1452_v54, %v1451_v51  ;;  %v1636_v61 = vpack.c.bf16 %v1577_v55, %v1577_v55 }
 0x2d4   : > { %1669 = vst.msk [vmem:[%s2893_s8 + $0x38] sm:$0xf] %vm1654_vm1, %v1636_v61  ;;  %1616 = vmatmul.bf16.gmra.mxu1 %v1468_v57 }
 0x2d9   : > { %v1579_v58 = vpop.f32.mrf.mxu1 }
 0x2da   : > { %v1637_v59 = vpack.c.bf16 %v1579_v58, %v1579_v58 }
 0x2dc   : > { %1670 = vst.msk [vmem:[%s2893_s8 + $0x3c] sm:$0xf] %vm1654_vm1, %v1637_v59 }
 0x2e1   : > { %v1582_v60 = vpop.f32.mrf.mxu1 }
 0x2e2   : > { %v1638_v10 = vpack.c.bf16 %v1582_v60, %v1582_v60 }
 0x2e4   : > { %1671 = vst.msk [vmem:[%s2893_s8 + $0x40] sm:$0xf] %vm1654_vm1, %v1638_v10 }
 0x2e9   : > { %v1584_v31 = vpop.f32.mrf.mxu1 }
 0x2ea   : > { %v1639_v62 = vpack.c.bf16 %v1584_v31, %v1584_v31 }
 0x2ec   : > { %1672 = vst.msk [vmem:[%s2893_s8 + $0x44] sm:$0xf] %vm1654_vm1, %v1639_v62 }
 0x2f1   : > { %v1587_v63 = vpop.f32.mrf.mxu1 }
 0x2f2   : > { %v1640_v9 = vpack.c.bf16 %v1587_v63, %v1587_v63 }
 0x2f4   : > { %1673 = vst.msk [vmem:[%s2893_s8 + $0x48] sm:$0xf] %vm1654_vm1, %v1640_v9 }
 0x2f9   : > { %v1589_v0 = vpop.f32.mrf.mxu1 }
 0x2fa   : > { %v1641_v3 = vpack.c.bf16 %v1589_v0, %v1589_v0 }
 0x2fc   : > { %1674 = vst.msk [vmem:[%s2893_s8 + $0x4c] sm:$0xf] %vm1654_vm1, %v1641_v3 }
 0x301   : > { %v1592_v5 = vpop.f32.mrf.mxu1 }
 0x302   : > { %v1642_v6 = vpack.c.bf16 %v1592_v5, %v1592_v5 }
 0x304   : > { %1675 = vst.msk [vmem:[%s2893_s8 + $0x50] sm:$0xf] %vm1654_vm1, %v1642_v6 }
 0x309   : > { %v1594_v18 = vpop.f32.mrf.mxu1 }
 0x30a   : > { %v1643_v7 = vpack.c.bf16 %v1594_v18, %v1594_v18 }
 0x30c   : > { %1676 = vst.msk [vmem:[%s2893_s8 + $0x54] sm:$0xf] %vm1654_vm1, %v1643_v7 }
 0x311   : > { %v1597_v8 = vpop.f32.mrf.mxu1 }
 0x312   : > { %v1644_v11 = vpack.c.bf16 %v1597_v8, %v1597_v8 }
 0x314   : > { %1677 = vst.msk [vmem:[%s2893_s8 + $0x58] sm:$0xf] %vm1654_vm1, %v1644_v11 }
 0x319   : > { %v1599_v12 = vpop.f32.mrf.mxu1 }
 0x31a   : > { %v1645_v13 = vpack.c.bf16 %v1599_v12, %v1599_v12 }
 0x31c   : > { %1678 = vst.msk [vmem:[%s2893_s8 + $0x5c] sm:$0xf] %vm1654_vm1, %v1645_v13 }
 0x321   : > { %v1602_v15 = vpop.f32.mrf.mxu1 }
 0x322   : > { %v1646_v1 = vpack.c.bf16 %v1602_v15, %v1602_v15 }
 0x324   : > { %1679 = vst.msk [vmem:[%s2893_s8 + $0x60] sm:$0xf] %vm1654_vm1, %v1646_v1 }
 0x329   : > { %v1604_v2 = vpop.f32.mrf.mxu1 }
 0x32a   : > { %v1647_v14 = vpack.c.bf16 %v1604_v2, %v1604_v2 }
 0x32c   : > { %1680 = vst.msk [vmem:[%s2893_s8 + $0x64] sm:$0xf] %vm1654_vm1, %v1647_v14 }
 0x331   : > { %v1607_v28 = vpop.f32.mrf.mxu1 }
 0x332   : > { %v1648_v25 = vpack.c.bf16 %v1607_v28, %v1607_v28 }
 0x334   : > { %1681 = vst.msk [vmem:[%s2893_s8 + $0x68] sm:$0xf] %vm1654_vm1, %v1648_v25 }
 0x339   : > { %v1609_v16 = vpop.f32.mrf.mxu1 }
 0x33a   : > { %v1649_v17 = vpack.c.bf16 %v1609_v16, %v1609_v16 }
 0x33c   : > { %1682 = vst.msk [vmem:[%s2893_s8 + $0x6c] sm:$0xf] %vm1654_vm1, %v1649_v17 }
 0x341   : > { %v1612_v19 = vpop.f32.mrf.mxu1 }
 0x342   : > { %v1650_v20 = vpack.c.bf16 %v1612_v19, %v1612_v19 }
 0x344   : > { %1683 = vst.msk [vmem:[%s2893_s8 + $0x70] sm:$0xf] %vm1654_vm1, %v1650_v20 }
 0x349   : > { %v1614_v36 = vpop.f32.mrf.mxu1 }
 0x34a   : > { %v1651_v21 = vpack.c.bf16 %v1614_v36, %v1614_v36 }
 0x34c   : > { %1684 = vst.msk [vmem:[%s2893_s8 + $0x74] sm:$0xf] %vm1654_vm1, %v1651_v21 }
 0x351   : > { %v1617_v22 = vpop.f32.mrf.mxu1 }
 0x352   : > { %v1652_v23 = vpack.c.bf16 %v1617_v22, %v1617_v22 }
 0x354   : > { %1685 = vst.msk [vmem:[%s2893_s8 + $0x78] sm:$0xf] %vm1654_vm1, %v1652_v23 }
 0x359   : > { %v1619_v24 = vpop.f32.mrf.mxu1 }
 0x35a   : > { %v1653_v26 = vpack.c.bf16 %v1619_v24, %v1619_v24 }
 0x35c   : > { %1686 = vst.msk [vmem:[%s2893_s8 + $0x7c] sm:$0xf] %vm1654_vm1, %v1653_v26 }
 0x35d PF: > { %p15_p7 = scmp.ge.s32.totalorder %s2492_s23, 4   ;;  %s2995_s18 = smov %s2430_s19 }
 0x35e   : > { %s2996_s19 = smov %s2434_s20  ;;  %s2997_s20 = smov %s2502_s26 }
 0x35f   : > { %s2998_s21 = smov %s2492_s23  ;;  %17 = sbr.rel (!%p15_p7) target bundleno = 3 (0x3), region = 80 }
 0x364   :  { %1709 = vsyncpa [#allocation3], 1 }
 0x365   :  { %1711 = vsyncpa [#allocation3 + $0x1], 1 }

</bundles_post_ra>
